<compile_context>
chip_gen: v5e
topology: v5e:2x2
jax: 0.10.0
libtpu: 0.0.40
codegen_flags: <defaults>
</compile_context>

<pallas_src>
import jax
import jax.numpy as jnp
import numpy as np
from jax.experimental import pallas as pl
from jax.experimental.pallas import tpu as pltpu

HIDDEN = 256
TILE_B = 128


def _round_up(n, m):
    return ((n + m - 1) // m) * m


def qnet_kernel(xT_ref, aT_ref, w1x_ref, w1a_ref, b1_ref, w2_ref, b2_ref,
                w3_ref, b3_ref, out_ref):
    # fc1: h1T = relu(W1x @ xT + W1a @ aT + b1)   -> (HIDDEN, TILE_B), f32 accum
    h1 = jnp.dot(w1x_ref[...], xT_ref[...], preferred_element_type=jnp.float32)
    h1 = h1 + jnp.dot(w1a_ref[...], aT_ref[...], preferred_element_type=jnp.float32)
    h1 = jnp.maximum(h1 + b1_ref[...], 0.0)            # f32 bias/ReLU (v5e-safe VPU)

    # fc2: bf16 operands into the MXU, f32 accumulate
    h2 = jnp.dot(w2_ref[...], h1.astype(jnp.bfloat16),
                 preferred_element_type=jnp.float32)
    h2 = jnp.maximum(h2 + b2_ref[...], 0.0)

    # fc3 (out_features == 1): VPU multiply + sublane reduce -> lane-dense (1, TILE_B)
    q = jnp.sum(w3_ref[...] * h2, axis=0, keepdims=True) + b3_ref[...]
    out_ref[...] = q.astype(out_ref.dtype)


def qnetwork_forward(x, a, kernel_params, *, tile_b=TILE_B):
    """x: (B, obs_dim) f32, a: (B, act_dim) f32 -> (B, 1) f32."""
    w1x, w1a, b1, w2, b2, w3, b3 = kernel_params
    B, obs_dim = x.shape
    act_dim = a.shape[1]

    # Pad batch to a lane-tile multiple so every store is a full 128-lane write.
    Bp = _round_up(max(B, 1), tile_b)
    pad = Bp - B
    xT = jnp.pad(x, ((0, pad), (0, 0))).T.astype(jnp.bfloat16)   # (obs_dim, Bp)
    aT = jnp.pad(a, ((0, pad), (0, 0))).T.astype(jnp.bfloat16)   # (act_dim, Bp)

    grid = (Bp // tile_b,)
    resident = lambda shape: pl.BlockSpec(shape, lambda i: (0, 0))  # weights stay in VMEM

    out = pl.pallas_call(
        qnet_kernel,
        out_shape=jax.ShapeDtypeStruct((1, Bp), jnp.float32),
        grid=grid,
        in_specs=[
            pl.BlockSpec((obs_dim, tile_b), lambda i: (0, i)),   # xT tile (bf16)
            pl.BlockSpec((act_dim, tile_b), lambda i: (0, i)),   # aT tile (bf16)
            resident((HIDDEN, obs_dim)),                         # w1x  (bf16)
            resident((HIDDEN, act_dim)),                         # w1a  (bf16)
            resident((HIDDEN, 1)),                               # b1   (f32)
            resident((HIDDEN, HIDDEN)),                          # w2   (bf16)
            resident((HIDDEN, 1)),                               # b2   (f32)
            resident((HIDDEN, 1)),                               # w3   (f32 column)
            resident((1, 1)),                                    # b3   (f32)
        ],
        out_specs=pl.BlockSpec((1, tile_b), lambda i: (0, i)),   # lane-dense Q row
        compiler_params=pltpu.CompilerParams(
            dimension_semantics=("parallel",),
            vmem_limit_bytes=8 << 20,
        ),
    )(xT, aT, w1x, w1a, b1, w2, b2, w3, b3)

    return out[0, :B].reshape(B, 1)


qnetwork_forward_jit = jax.jit(qnetwork_forward)


def init_params(key, obs_dim, act_dim):
    """f32 params in native PyTorch nn.Linear layout: W (out, in), b (out,)."""
    d_in = obs_dim + act_dim
    ks = jax.random.split(key, 6)

    def lin(kw, kb, fan_in, fan_out):
        bound = 1.0 / np.sqrt(fan_in)
        w = jax.random.uniform(kw, (fan_out, fan_in), jnp.float32, -bound, bound)
        b = jax.random.uniform(kb, (fan_out,), jnp.float32, -bound, bound)
        return w, b

    w1, b1 = lin(ks[0], ks[1], d_in, HIDDEN)
    w2, b2 = lin(ks[2], ks[3], HIDDEN, HIDDEN)
    w3, b3 = lin(ks[4], ks[5], HIDDEN, 1)
    return {"w1": w1, "b1": b1, "w2": w2, "b2": b2, "w3": w3, "b3": b3}


def pack_params(p, obs_dim):
    """Kernel-ready params: big matmul weights in bf16 (halved HBM traffic,
    native MXU path); vector-path operands (biases, fc3 row) kept f32."""
    w1x = p["w1"][:, :obs_dim].astype(jnp.bfloat16)    # (H, obs_dim)
    w1a = p["w1"][:, obs_dim:].astype(jnp.bfloat16)    # (H, act_dim)
    w2 = p["w2"].astype(jnp.bfloat16)                  # (H, H)
    b1 = p["b1"].reshape(HIDDEN, 1)
    b2 = p["b2"].reshape(HIDDEN, 1)
    w3 = p["w3"].reshape(HIDDEN, 1)                    # fc3 weight as a column
    b3 = p["b3"].reshape(1, 1)
    return (w1x, w1a, b1, w2, b2, w3, b3)


def reference_forward(x, a, kernel_params):
    """Pure-JAX reference with the same (bf16-quantized) weights, f32 math."""
    w1x, w1a, b1, w2, b2, w3, b3 = kernel_params
    w1 = jnp.concatenate([w1x, w1a], axis=1).astype(jnp.float32)   # (H, D)
    xa = jnp.concatenate([x, a], axis=1)                           # (B, D)
    h1 = jax.nn.relu(xa @ w1.T + b1[:, 0])
    h2 = jax.nn.relu(h1 @ w2.astype(jnp.float32).T + b2[:, 0])
    return h2 @ w3 + b3                                            # (B, 1)


if __name__ == "__main__":
    key = jax.random.PRNGKey(0)
    k_x, k_a, k_p, k_x2, k_a2 = jax.random.split(key, 5)

    OBS_DIM, ACT_DIM = 17, 6  # HalfCheetah-style dims
    params = pack_params(init_params(k_p, OBS_DIM, ACT_DIM), OBS_DIM)

    # Small batch (single grid step, padded lanes).
    B = 2
    x = jax.random.normal(k_x, (B, OBS_DIM), jnp.float32)
    a = jax.random.normal(k_a, (B, ACT_DIM), jnp.float32)
    out = jax.block_until_ready(qnetwork_forward_jit(x, a, params))
    ref = jax.block_until_ready(reference_forward(x, a, params))
    assert out.shape == (B, 1)
    np.testing.assert_allclose(np.asarray(out), np.asarray(ref), rtol=2e-2, atol=2e-2)

    # Multi-tile batch (exercises the 2-step grid and tail padding).
    B2 = 130
    x2 = jax.random.normal(k_x2, (B2, OBS_DIM), jnp.float32)
    a2 = jax.random.normal(k_a2, (B2, ACT_DIM), jnp.float32)
    out2 = jax.block_until_ready(qnetwork_forward_jit(x2, a2, params))
    ref2 = jax.block_until_ready(reference_forward(x2, a2, params))
    assert out2.shape == (B2, 1)
    np.testing.assert_allclose(np.asarray(out2), np.asarray(ref2), rtol=2e-2, atol=2e-2)

    print("KERNEL_OK")
</pallas_src>

<mosaic_0001>
module attributes {stable_mosaic.version = 11 : i64} {
  func.func @qnet_kernel(%arg0: i32, %arg1: memref<17x128xbf16, #tpu.memory_space<vmem>>, %arg2: memref<6x128xbf16, #tpu.memory_space<vmem>>, %arg3: memref<256x17xbf16, #tpu.memory_space<vmem>>, %arg4: memref<256x6xbf16, #tpu.memory_space<vmem>>, %arg5: memref<256x1xf32, #tpu.memory_space<vmem>>, %arg6: memref<256x256xbf16, #tpu.memory_space<vmem>>, %arg7: memref<256x1xf32, #tpu.memory_space<vmem>>, %arg8: memref<256x1xf32, #tpu.memory_space<vmem>>, %arg9: memref<1x1xf32, #tpu.memory_space<vmem>>, %arg10: memref<1x128xf32, #tpu.memory_space<vmem>>) attributes {dimension_semantics = [#tpu.dimension_semantics<parallel>], iteration_bounds = array<i64: 1>, scalar_prefetch = 0 : i64, scratch_operands = 0 : i64, tpu.core_type = #tpu.core_type<tc>, window_params = [{transform_indices = @transform_0, window_bounds = array<i64: 17, 128>}, {transform_indices = @transform_1, window_bounds = array<i64: 6, 128>}, {pipeline_mode = #tpu.pipeline_mode<synchronous>, transform_indices = @transform_2, window_bounds = array<i64: 256, 17>}, {pipeline_mode = #tpu.pipeline_mode<synchronous>, transform_indices = @transform_3, window_bounds = array<i64: 256, 6>}, {pipeline_mode = #tpu.pipeline_mode<synchronous>, transform_indices = @transform_4, window_bounds = array<i64: 256, 1>}, {pipeline_mode = #tpu.pipeline_mode<synchronous>, transform_indices = @transform_5, window_bounds = array<i64: 256, 256>}, {pipeline_mode = #tpu.pipeline_mode<synchronous>, transform_indices = @transform_6, window_bounds = array<i64: 256, 1>}, {pipeline_mode = #tpu.pipeline_mode<synchronous>, transform_indices = @transform_7, window_bounds = array<i64: 256, 1>}, {pipeline_mode = #tpu.pipeline_mode<synchronous>, transform_indices = @transform_8, window_bounds = array<i64: 1, 1>}, {transform_indices = @transform_9, window_bounds = array<i64: 1, 128>}]} {
    %c0 = arith.constant 0 : index
    %c0_0 = arith.constant 0 : index
    %0 = vector.load %arg3[%c0, %c0_0] : memref<256x17xbf16, #tpu.memory_space<vmem>>, vector<256x17xbf16>
    %c0_1 = arith.constant 0 : index
    %c0_2 = arith.constant 0 : index
    %1 = vector.load %arg1[%c0_1, %c0_2] : memref<17x128xbf16, #tpu.memory_space<vmem>>, vector<17x128xbf16>
    %cst = arith.constant dense<0.000000e+00> : vector<256x128xf32>
    %2 = tpu.matmul %0, %1, %cst {dimension_numbers = #tpu.dot_dimension_numbers<[1], [0], [0], [1], [0, 0, 1, 1], [], []>} : vector<256x17xbf16>, vector<17x128xbf16>, vector<256x128xf32> -> vector<256x128xf32>
    %c0_3 = arith.constant 0 : index
    %c0_4 = arith.constant 0 : index
    %3 = vector.load %arg4[%c0_3, %c0_4] : memref<256x6xbf16, #tpu.memory_space<vmem>>, vector<256x6xbf16>
    %c0_5 = arith.constant 0 : index
    %c0_6 = arith.constant 0 : index
    %4 = vector.load %arg2[%c0_5, %c0_6] : memref<6x128xbf16, #tpu.memory_space<vmem>>, vector<6x128xbf16>
    %cst_7 = arith.constant dense<0.000000e+00> : vector<256x128xf32>
    %5 = tpu.matmul %3, %4, %cst_7 {dimension_numbers = #tpu.dot_dimension_numbers<[1], [0], [0], [1], [0, 0, 1, 1], [], []>} : vector<256x6xbf16>, vector<6x128xbf16>, vector<256x128xf32> -> vector<256x128xf32>
    %6 = arith.addf %2, %5 : vector<256x128xf32>
    %c0_8 = arith.constant 0 : index
    %c0_9 = arith.constant 0 : index
    %7 = vector.load %arg5[%c0_8, %c0_9] : memref<256x1xf32, #tpu.memory_space<vmem>>, vector<256x1xf32>
    %8 = vector.broadcast %7 : vector<256x1xf32> to vector<256x128xf32>
    %9 = arith.addf %6, %8 : vector<256x128xf32>
    %cst_10 = arith.constant 0.000000e+00 : f32
    %10 = vector.broadcast %cst_10 : f32 to vector<256x128xf32>
    %11 = arith.maximumf %9, %10 : vector<256x128xf32>
    %c0_11 = arith.constant 0 : index
    %c0_12 = arith.constant 0 : index
    %12 = vector.load %arg6[%c0_11, %c0_12] : memref<256x256xbf16, #tpu.memory_space<vmem>>, vector<256x256xbf16>
    %13 = arith.truncf %11 : vector<256x128xf32> to vector<256x128xbf16>
    %cst_13 = arith.constant dense<0.000000e+00> : vector<256x128xf32>
    %14 = tpu.matmul %12, %13, %cst_13 {dimension_numbers = #tpu.dot_dimension_numbers<[1], [0], [0], [1], [0, 0, 1, 1], [], []>} : vector<256x256xbf16>, vector<256x128xbf16>, vector<256x128xf32> -> vector<256x128xf32>
    %c0_14 = arith.constant 0 : index
    %c0_15 = arith.constant 0 : index
    %15 = vector.load %arg7[%c0_14, %c0_15] : memref<256x1xf32, #tpu.memory_space<vmem>>, vector<256x1xf32>
    %16 = vector.broadcast %15 : vector<256x1xf32> to vector<256x128xf32>
    %17 = arith.addf %14, %16 : vector<256x128xf32>
    %cst_16 = arith.constant 0.000000e+00 : f32
    %18 = vector.broadcast %cst_16 : f32 to vector<256x128xf32>
    %19 = arith.maximumf %17, %18 : vector<256x128xf32>
    %c0_17 = arith.constant 0 : index
    %c0_18 = arith.constant 0 : index
    %20 = vector.load %arg8[%c0_17, %c0_18] : memref<256x1xf32, #tpu.memory_space<vmem>>, vector<256x1xf32>
    %21 = vector.broadcast %20 : vector<256x1xf32> to vector<256x128xf32>
    %22 = arith.mulf %21, %19 : vector<256x128xf32>
    %cst_19 = arith.constant dense<0.000000e+00> : vector<128xf32>
    %23 = vector.multi_reduction <add>, %22, %cst_19 [0] : vector<256x128xf32> to vector<128xf32>
    %24 = vector.shape_cast %23 : vector<128xf32> to vector<1x128xf32>
    %c0_20 = arith.constant 0 : index
    %c0_21 = arith.constant 0 : index
    %25 = vector.load %arg9[%c0_20, %c0_21] : memref<1x1xf32, #tpu.memory_space<vmem>>, vector<1x1xf32>
    %26 = vector.broadcast %25 : vector<1x1xf32> to vector<1x128xf32>
    %27 = arith.addf %24, %26 : vector<1x128xf32>
    %c0_22 = arith.constant 0 : index
    %c0_23 = arith.constant 0 : index
    %28 = vector.load %arg10[%c0_22, %c0_23] : memref<1x128xf32, #tpu.memory_space<vmem>>, vector<1x128xf32>
    tpu.vector_store %arg10[%c0_22, %c0_23], %27 {strides = array<i32>} : memref<1x128xf32, #tpu.memory_space<vmem>>, vector<1x128xf32>,
    return
  }
  func.func @transform_0(%arg0: i32) -> (i32, i32) {
    %c0_i32 = arith.constant 0 : i32
    %c0_i32_0 = arith.constant 0 : i32
    return %c0_i32, %arg0 : i32, i32
  }
  func.func @transform_1(%arg0: i32) -> (i32, i32) {
    %c0_i32 = arith.constant 0 : i32
    %c0_i32_0 = arith.constant 0 : i32
    return %c0_i32, %arg0 : i32, i32
  }
  func.func @transform_2(%arg0: i32) -> (i32, i32) {
    %c0_i32 = arith.constant 0 : i32
    %c0_i32_0 = arith.constant 0 : i32
    %c0_i32_1 = arith.constant 0 : i32
    return %c0_i32, %c0_i32_0 : i32, i32
  }
  func.func @transform_3(%arg0: i32) -> (i32, i32) {
    %c0_i32 = arith.constant 0 : i32
    %c0_i32_0 = arith.constant 0 : i32
    %c0_i32_1 = arith.constant 0 : i32
    return %c0_i32, %c0_i32_0 : i32, i32
  }
  func.func @transform_4(%arg0: i32) -> (i32, i32) {
    %c0_i32 = arith.constant 0 : i32
    %c0_i32_0 = arith.constant 0 : i32
    %c0_i32_1 = arith.constant 0 : i32
    return %c0_i32, %c0_i32_0 : i32, i32
  }
  func.func @transform_5(%arg0: i32) -> (i32, i32) {
    %c0_i32 = arith.constant 0 : i32
    %c0_i32_0 = arith.constant 0 : i32
    %c0_i32_1 = arith.constant 0 : i32
    return %c0_i32, %c0_i32_0 : i32, i32
  }
  func.func @transform_6(%arg0: i32) -> (i32, i32) {
    %c0_i32 = arith.constant 0 : i32
    %c0_i32_0 = arith.constant 0 : i32
    %c0_i32_1 = arith.constant 0 : i32
    return %c0_i32, %c0_i32_0 : i32, i32
  }
  func.func @transform_7(%arg0: i32) -> (i32, i32) {
    %c0_i32 = arith.constant 0 : i32
    %c0_i32_0 = arith.constant 0 : i32
    %c0_i32_1 = arith.constant 0 : i32
    return %c0_i32, %c0_i32_0 : i32, i32
  }
  func.func @transform_8(%arg0: i32) -> (i32, i32) {
    %c0_i32 = arith.constant 0 : i32
    %c0_i32_0 = arith.constant 0 : i32
    %c0_i32_1 = arith.constant 0 : i32
    return %c0_i32, %c0_i32_0 : i32, i32
  }
  func.func @transform_9(%arg0: i32) -> (i32, i32) {
    %c0_i32 = arith.constant 0 : i32
    %c0_i32_0 = arith.constant 0 : i32
    return %c0_i32, %arg0 : i32, i32
  }
}

</mosaic_0001>

<bundles_post_ra>
// kernel: qnetwork_forward.1
= control target key start
LH: loop header
LB: loop body
LE: loop exit
PB: predicated region body
PF: predicated region fallthrough
CT: control target
= control target key end

     0   :  { %vm232_vm0 = vcmask 1042432   ;;  %v2059_v0 = vmov 0   ;;  %vm463_vm1 = vcmask 1040384   ;;  %vm183_vm2 = vcmask 48128   ;;  %s2926_s4 = inlined_call_operand.vmem [shape: f32[256,1], index: 4, kind: input, shape index: {}]   ;;  %s2927_s1 = inlined_call_operand.vmem [shape: bf16[6,128], index: 1, kind: input, shape index: {}]   ;;  %s2928_s3 = inlined_call_operand.vmem [shape: bf16[256,6], index: 3, kind: input, shape index: {}]   ;;  %s2929_s0 = inlined_call_operand.vmem [shape: bf16[17,128], index: 0, kind: input, shape index: {}]   ;;  %s2930_s2 = inlined_call_operand.vmem [shape: bf16[256,17], index: 2, kind: input, shape index: {}]   ;;  %s2931_s6 = inlined_call_operand.vmem [shape: f32[256,1], index: 6, kind: input, shape index: {}]   ;;  %s2932_s7 = inlined_call_operand.vmem [shape: f32[256,1], index: 7, kind: input, shape index: {}]   ;;  %s2933_s8 = inlined_call_operand.<no memory space> [shape: f32[1,1], index: 8, kind: input, shape index: {}]   ;;  %s2934_s5 = inlined_call_operand.vmem [shape: bf16[256,256], index: 5, kind: input, shape index: {}]   ;;  %s2935_s9 = inlined_call_operand.vmem [shape: f32[1,128], index: 9, kind: output, shape index: {}]  }
   0x1   :  { %2058 = vset.pattern.permute.xlu2 %v2059_v0  ;;  %2057 = vset.pattern.permute.xlu1 %v2059_v0  ;;  %v562_v1 = vld [vmem:[%s2926_s4 + $0x20] sm:$0xff]  ;;  %v560_v2 = vld [vmem:[%s2926_s4 + $0x10] sm:$0xff]  ;;  %v69_v5 = vld [vmem:[%s2929_s0 + $0x8] sm:$0x1]  ;;  %v465_v9 = vsel %vm463_vm1, 65535, %v2059_v0  ;;  %vm414_vm3 = vcmask 138240  }
   0x2   :  { %v558_v3 = vld [vmem:[%s2926_s4] sm:$0xff]  ;;  %2056 = vset.pattern.permute.xlu0 %v2059_v0  ;;  %612 = vperm.xlu2 %2058, %v562_v1   ;;  %v410_v8 = vunpack.c.l.b16 %v69_v5  ;;  %v563_v12 = vld [vmem:[%s2926_s4 + $0x28] sm:$0xff]  ;;  %v561_v13 = vld [vmem:[%s2926_s4 + $0x18] sm:$0xff] }
   0x3   :  { %v102_v4 = vld [vmem:[%s2927_s1] sm:$0x7]  ;;  %602 = vperm.xlu1 %2057, %v560_v2   ;;  %592 = vperm.xlu0 %2056, %v558_v3   ;;  %v559_v14 = vld [vmem:[%s2926_s4 + $0x8] sm:$0xff]  ;;  %v565_v18 = vld [vmem:[%s2926_s4 + $0x38] sm:$0xff] }
   0x4   :  { %v234_v6 = vsel %vm232_vm0, %v102_v4, 0  ;;  %v2007_v7 = vld [vmem:[%s2928_s3] sm:$0xff]  ;;  %v412_v10 = vpack.c.b16 %v410_v8, %v410_v8  ;;  %v564_v19 = vld [vmem:[%s2926_s4 + $0x30] sm:$0xff]  ;;  %v2008_v20 = vld [vmem:[%s2928_s3 + $0x8] sm:$0xff] }
   0x5   :  { %243 = vmatpush.bf16.msra.mxu0 %v234_v6  ;;  %v2006_v15 = vld [vmem:[%s2929_s0] sm:$0xff]  ;;  %v569_v21 = vld [vmem:[%s2926_s4 + $0x58] sm:$0xff]  ;;  %v568_v22 = vld [vmem:[%s2926_s4 + $0x50] sm:$0xff] }
   0x6   :  { %v467_v11 = vand.u32 %v465_v9, %v412_v10  ;;  %v1990_v16 = vld [vmem:[%s2930_s2] sm:$0xff]  ;;  %v567_v23 = vld [vmem:[%s2926_s4 + $0x48] sm:$0xff]  ;;  %v572_v25 = vld [vmem:[%s2926_s4 + $0x70] sm:$0xff] }
   0x7   :  { %v566_v17 = vld [vmem:[%s2926_s4 + $0x40] sm:$0xff]  ;;  %v1991_v24 = vld [vmem:[%s2930_s2 + $0x8] sm:$0xff]  ;;  %v2009_v28 = vld [vmem:[%s2928_s3 + $0x10] sm:$0xff] }
   0x8   :  { %1762 = vmatmul.msk.bf16.vlgmr.msra.gmra.mxu0 %vm183_vm2, %v2007_v7  ;;  %475 = vmatpush.bf16.msra.mxu1 %v467_v11  ;;  %v571_v26 = vld [vmem:[%s2926_s4 + $0x68] sm:$0xff]  ;;  %v570_v27 = vld [vmem:[%s2926_s4 + $0x60] sm:$0xff]  ;;  %v573_v31 = vld [vmem:[%s2926_s4 + $0x78] sm:$0xff] }
   0x9   :  { %v575_v29 = vld [vmem:[%s2926_s4 + $0x88] sm:$0xff]  ;;  %v574_v30 = vld [vmem:[%s2926_s4 + $0x80] sm:$0xff]  ;;  %v1992_v32 = vld [vmem:[%s2930_s2 + $0x10] sm:$0xff] }
   0xa   :  { %617 = vperm.xlu2 %2058, %v563_v12   ;;  %v586_v33 = vld [vmem:[%s2926_s4 + $0xe0] sm:$0xff]  ;;  %v589_v34 = vld [vmem:[%s2926_s4 + $0xf8] sm:$0xff]  ;;  %v588_v35 = vld [vmem:[%s2926_s4 + $0xf0] sm:$0xff] }
   0xb   :  { %607 = vperm.xlu1 %2057, %v561_v13   ;;  %597 = vperm.xlu0 %2056, %v559_v14   ;;  %v2010_v36 = vld [vmem:[%s2928_s3 + $0x18] sm:$0xff]  ;;  %v584_v38 = vld [vmem:[%s2926_s4 + $0xd0] sm:$0xff]  ;;  %v587_v39 = vld [vmem:[%s2926_s4 + $0xe8] sm:$0xff] }
   0xc   :  { %476 = vmatpush.bf16.msra.mxu1 %v2006_v15  ;;  %v585_v37 = vld [vmem:[%s2926_s4 + $0xd8] sm:$0xff]  ;;  %v580_v41 = vld [vmem:[%s2926_s4 + $0xb0] sm:$0xff]  ;;  %v583_v42 = vld [vmem:[%s2926_s4 + $0xc8] sm:$0xff] }
   0xd   :  { %v1993_v40 = vld [vmem:[%s2930_s2 + $0x18] sm:$0xff]  ;;  %v582_v43 = vld [vmem:[%s2926_s4 + $0xc0] sm:$0xff]  ;;  %v579_v45 = vld [vmem:[%s2926_s4 + $0xa8] sm:$0xff] }
   0xe   :  { %v2011_v44 = vld [vmem:[%s2928_s3 + $0x20] sm:$0xff]  ;;  %v581_v47 = vld [vmem:[%s2926_s4 + $0xb8] sm:$0xff]  ;;  %v576_v51 = vld [vmem:[%s2926_s4 + $0x90] sm:$0xff] }
   0xf   :  { %1846 = vmatmul.msk.bf16.vlgmr.msra.gmra.mxu1 %vm414_vm3, %v1990_v16  ;;  %v578_v46 = vld [vmem:[%s2926_s4 + $0xa0] sm:$0xff]  ;;  %v577_v50 = vld [vmem:[%s2926_s4 + $0x98] sm:$0xff]  ;;  %v2012_v52 = vld [vmem:[%s2928_s3 + $0x28] sm:$0xff] }
  0x10   :  { %v1994_v48 = vld [vmem:[%s2930_s2 + $0x20] sm:$0xff]  ;;  %v865_v53 = vld [vmem:[%s2931_s6 + $0x18] sm:$0xff]  ;;  %v864_v54 = vld [vmem:[%s2931_s6 + $0x10] sm:$0xff] }
  0x11   :  { %v862_v49 = vld [vmem:[%s2931_s6] sm:$0xff]  ;;  %v863_v55 = vld [vmem:[%s2931_s6 + $0x8] sm:$0xff]  ;;  %v868_v57 = vld [vmem:[%s2931_s6 + $0x30] sm:$0xff] }
  0x12   :  { %632 = vperm.xlu2 %2058, %v566_v17   ;;  %v1995_v56 = vld [vmem:[%s2930_s2 + $0x28] sm:$0xff]  ;;  %v866_v59 = vld [vmem:[%s2931_s6 + $0x20] sm:$0xff]  ;;  %v2013_v60 = vld [vmem:[%s2928_s3 + $0x30] sm:$0xff] }
  0x13   :  { %627 = vperm.xlu1 %2057, %v565_v18   ;;  %622 = vperm.xlu0 %2056, %v564_v19   ;;  %v867_v58 = vld [vmem:[%s2931_s6 + $0x28] sm:$0xff]  ;;  %v870_v62 = vld [vmem:[%s2931_s6 + $0x40] sm:$0xff]  ;;  %v869_v63 = vld [vmem:[%s2931_s6 + $0x38] sm:$0xff] }
  0x14   :  { %v871_v61 = vld [vmem:[%s2931_s6 + $0x48] sm:$0xff]  ;;  %v1996_v0 = vld [vmem:[%s2930_s2 + $0x30] sm:$0xff]  ;;  %v874_v1 = vld [vmem:[%s2931_s6 + $0x60] sm:$0xff] }
  0x15   :  { %v873_v2 = vld [vmem:[%s2931_s6 + $0x58] sm:$0xff]  ;;  %v872_v3 = vld [vmem:[%s2931_s6 + $0x50] sm:$0xff]  ;;  %v875_v7 = vld [vmem:[%s2931_s6 + $0x68] sm:$0xff] }
  0x16   :  { %v2014_v4 = vld [vmem:[%s2928_s3 + $0x38] sm:$0xff]  ;;  %v876_v6 = vld [vmem:[%s2931_s6 + $0x70] sm:$0xff]  ;;  %v879_v10 = vld [vmem:[%s2931_s6 + $0x88] sm:$0xff] }
  0x17   :  { %v877_v5 = vld [vmem:[%s2931_s6 + $0x78] sm:$0xff]  ;;  %v880_v9 = vld [vmem:[%s2931_s6 + $0x90] sm:$0xff]  ;;  %v878_v11 = vld [vmem:[%s2931_s6 + $0x80] sm:$0xff] }
  0x18   :  { %1763 = vmatmul.msk.bf16.gmra.mxu0 %vm183_vm2, %v2008_v20  ;;  %v1997_v8 = vld [vmem:[%s2930_s2 + $0x38] sm:$0xff]  ;;  %v2015_v12 = vld [vmem:[%s2928_s3 + $0x40] sm:$0xff]  ;;  %v883_v14 = vld [vmem:[%s2931_s6 + $0xa8] sm:$0xff] }
  0x19   :  { %v882_v15 = vld [vmem:[%s2931_s6 + $0xa0] sm:$0xff]  ;;  %v881_v16 = vld [vmem:[%s2931_s6 + $0x98] sm:$0xff] }
  0x1a   :  { %647 = vperm.xlu2 %2058, %v569_v21   ;;  %v1998_v18 = vld [vmem:[%s2930_s2 + $0x40] sm:$0xff] }
  0x1b   :  { %642 = vperm.xlu1 %2057, %v568_v22   ;;  %637 = vperm.xlu0 %2056, %v567_v23   ;;  %v886_v22 = vld [vmem:[%s2931_s6 + $0xc0] sm:$0xff]  ;;  %v885_v23 = vld [vmem:[%s2931_s6 + $0xb8] sm:$0xff] }
  0x1f   :  { %1847 = vmatmul.msk.bf16.gmra.mxu1 %vm414_vm3, %v1991_v24  ;;  %v884_v24 = vld [vmem:[%s2931_s6 + $0xb0] sm:$0xff] }
  0x22   :  { %662 = vperm.xlu2 %2058, %v572_v25  }
  0x23   :  { %657 = vperm.xlu1 %2057, %v571_v26   ;;  %652 = vperm.xlu0 %2056, %v570_v27   ;;  %v2016_v26 = vld [vmem:[%s2928_s3 + $0x48] sm:$0xff] }
  0x28   :  { %1764 = vmatmul.msk.bf16.gmra.mxu0 %vm183_vm2, %v2009_v28 }
  0x2a   :  { %677 = vperm.xlu2 %2058, %v575_v29  }
  0x2b   :  { %672 = vperm.xlu1 %2057, %v574_v30   ;;  %667 = vperm.xlu0 %2056, %v573_v31   ;;  %v889_v30 = vld [vmem:[%s2931_s6 + $0xd8] sm:$0xff] }
  0x2f   :  { %1848 = vmatmul.msk.bf16.gmra.mxu1 %vm414_vm3, %v1992_v32  ;;  %v888_v32 = vld [vmem:[%s2931_s6 + $0xd0] sm:$0xff] }
  0x32   :  { %732 = vperm.xlu2 %2058, %v586_v33   ;;  %v887_v33 = vld [vmem:[%s2931_s6 + $0xc8] sm:$0xff] }
  0x33   :  { %747 = vperm.xlu1 %2057, %v589_v34   ;;  %742 = vperm.xlu0 %2056, %v588_v35  }
  0x38   :  { %1765 = vmatmul.msk.bf16.gmra.mxu0 %vm183_vm2, %v2010_v36 }
  0x3a   :  { %727 = vperm.xlu2 %2058, %v585_v37  }
  0x3b   :  { %722 = vperm.xlu1 %2057, %v584_v38   ;;  %737 = vperm.xlu0 %2056, %v587_v39   ;;  %v1999_v38 = vld [vmem:[%s2930_s2 + $0x48] sm:$0xff] }
  0x3f   :  { %1849 = vmatmul.msk.bf16.gmra.mxu1 %vm414_vm3, %v1993_v40 }
  0x42   :  { %702 = vperm.xlu2 %2058, %v580_v41  }
  0x43   :  { %717 = vperm.xlu1 %2057, %v583_v42   ;;  %712 = vperm.xlu0 %2056, %v582_v43   ;;  %v892_v43 = vld [vmem:[%s2931_s6 + $0xf0] sm:$0xff] }
  0x48   :  { %1766 = vmatmul.msk.bf16.gmra.mxu0 %vm183_vm2, %v2011_v44  ;;  %v891_v44 = vld [vmem:[%s2931_s6 + $0xe8] sm:$0xff] }
  0x4a   :  { %697 = vperm.xlu2 %2058, %v579_v45   ;;  %v890_v45 = vld [vmem:[%s2931_s6 + $0xe0] sm:$0xff] }
  0x4b   :  { %692 = vperm.xlu1 %2057, %v578_v46   ;;  %707 = vperm.xlu0 %2056, %v581_v47   ;;  %v2017_v46 = vld [vmem:[%s2928_s3 + $0x50] sm:$0xff] }
  0x4f   :  { %1850 = vmatmul.msk.bf16.gmra.mxu1 %vm414_vm3, %v1994_v48 }
  0x52   :  { %896 = vperm.xlu2 %2058, %v862_v49  }
  0x53   :  { %687 = vperm.xlu1 %2057, %v577_v50   ;;  %682 = vperm.xlu0 %2056, %v576_v51   ;;  %v1425_v51 = vld [vmem:[%s2932_s7 + $0x8] sm:$0xff] }
  0x58   :  { %1767 = vmatmul.msk.bf16.gmra.mxu0 %vm183_vm2, %v2012_v52 }
  0x5a   :  { %911 = vperm.xlu2 %2058, %v865_v53   ;;  %v1424_v53 = vld [vmem:[%s2932_s7] sm:$0xff] }
  0x5b   :  { %906 = vperm.xlu1 %2057, %v864_v54   ;;  %901 = vperm.xlu0 %2056, %v863_v55   ;;  %v893_v54 = vld [vmem:[%s2931_s6 + $0xf8] sm:$0xff] }
  0x5f   :  { %1851 = vmatmul.msk.bf16.gmra.mxu1 %vm414_vm3, %v1995_v56 }
  0x62   :  { %926 = vperm.xlu2 %2058, %v868_v57  }
  0x63   :  { %921 = vperm.xlu1 %2057, %v867_v58   ;;  %916 = vperm.xlu0 %2056, %v866_v59   ;;  %v2000_v59 = vld [vmem:[%s2930_s2 + $0x50] sm:$0xff] }
  0x68   :  { %1768 = vmatmul.msk.bf16.gmra.mxu0 %vm183_vm2, %v2013_v60 }
  0x6a   :  { %941 = vperm.xlu2 %2058, %v871_v61   ;;  %v613_v61 = vpop.permute.xlu2 %612 }
  0x6b   :  { %936 = vperm.xlu1 %2057, %v870_v62   ;;  %931 = vperm.xlu0 %2056, %v869_v63  }
  0x6f   :  { %1852 = vmatmul.msk.bf16.gmra.mxu1 %vm414_vm3, %v1996_v0  ;;  %v1428_v0 = vld [vmem:[%s2932_s7 + $0x20] sm:$0xff] }
  0x72   :  { %956 = vperm.xlu2 %2058, %v874_v1   ;;  %v1427_v1 = vld [vmem:[%s2932_s7 + $0x18] sm:$0xff] }
  0x73   :  { %951 = vperm.xlu1 %2057, %v873_v2   ;;  %946 = vperm.xlu0 %2056, %v872_v3   ;;  %v1426_v2 = vld [vmem:[%s2932_s7 + $0x10] sm:$0xff]  ;;  %v2018_v3 = vld [vmem:[%s2928_s3 + $0x58] sm:$0xff] }
  0x75   :  { %v593_v19 = vpop.permute.xlu0 %592  ;;  %v603_v40 = vpop.permute.xlu1 %602 }
  0x78   :  { %1769 = vmatmul.msk.bf16.gmra.mxu0 %vm183_vm2, %v2014_v4 }
  0x7a   :  { %971 = vperm.xlu2 %2058, %v877_v5  }
  0x7b   :  { %966 = vperm.xlu1 %2057, %v876_v6   ;;  %961 = vperm.xlu0 %2056, %v875_v7  }
  0x7d   :  { %v598_v31 = vpop.permute.xlu0 %597  ;;  %v608_v52 = vpop.permute.xlu1 %607 }
  0x7f   :  { %1853 = vmatmul.msk.bf16.gmra.mxu1 %vm414_vm3, %v1997_v8  ;;  %v1431_v8 = vld [vmem:[%s2932_s7 + $0x38] sm:$0xff] }
  0x82   :  { %986 = vperm.xlu2 %2058, %v880_v9   ;;  %v618_v9 = vpop.permute.xlu2 %617 }
  0x83   :  { %981 = vperm.xlu1 %2057, %v879_v10   ;;  %976 = vperm.xlu0 %2056, %v878_v11   ;;  %v1430_v10 = vld [vmem:[%s2932_s7 + $0x30] sm:$0xff]  ;;  %v1429_v11 = vld [vmem:[%s2932_s7 + $0x28] sm:$0xff] }
  0x85   :  { %v245_v13 = vpop.f32.mrf.mxu0 }
  0x88   :  { %1770 = vmatmul.msk.bf16.gmra.mxu0 %vm183_vm2, %v2015_v12 }
  0x8a   :  { %1001 = vperm.xlu2 %2058, %v883_v14  }
  0x8b   :  { %996 = vperm.xlu1 %2057, %v882_v15   ;;  %991 = vperm.xlu0 %2056, %v881_v16   ;;  %v2001_v16 = vld [vmem:[%s2930_s2 + $0x58] sm:$0xff] }
  0x8c   :  { %v478_v20 = vpop.f32.mrf.mxu1 }
  0x8d   :  { %v247_v17 = vpop.f32.mrf.mxu0  ;;  %v479_v21 = vadd.f32 %v478_v20, %v245_v13  ;;  %v1434_v20 = vld [vmem:[%s2932_s7 + $0x50] sm:$0xff] }
  0x8f   :  { %1854 = vmatmul.msk.bf16.gmra.mxu1 %vm414_vm3, %v1998_v18  ;;  %v750_v25 = vadd.f32 %v593_v19, %v479_v21  ;;  %v1433_v21 = vld [vmem:[%s2932_s7 + $0x48] sm:$0xff] }
  0x91   :  { %v782_v35 = vmax.f32 %v750_v25, 0.0  ;;  %v623_v25 = vpop.permute.xlu0 %622 }
  0x92   :  { %1016 = vperm.xlu2 %2058, %v886_v22   ;;  %v1432_v22 = vld [vmem:[%s2932_s7 + $0x40] sm:$0xff] }
  0x93   :  { %1011 = vperm.xlu1 %2057, %v885_v23   ;;  %1006 = vperm.xlu0 %2056, %v884_v24   ;;  %v2019_v23 = vld [vmem:[%s2928_s3 + $0x60] sm:$0xff] }
  0x94   :  { %v480_v28 = vpop.f32.mrf.mxu1 }
  0x95   :  { %v250_v27 = vpop.f32.mrf.mxu0  ;;  %v481_v29 = vadd.f32 %v480_v28, %v247_v17 }
  0x97   :  { %v751_v34 = vadd.f32 %v598_v31, %v481_v29  ;;  %v1437_v29 = vld [vmem:[%s2932_s7 + $0x68] sm:$0xff]  ;;  %v1436_v31 = vld [vmem:[%s2932_s7 + $0x60] sm:$0xff] }
  0x98   :  { %1771 = vmatmul.msk.bf16.gmra.mxu0 %vm183_vm2, %v2016_v26 }
  0x99   :  { %v783_v36 = vmax.f32 %v751_v34, 0.0 }
  0x9a   :  { %1031 = vperm.xlu2 %2058, %v889_v30   ;;  %v628_v30 = vpop.permute.xlu1 %627 }
  0x9b   :  { %1026 = vperm.xlu1 %2057, %v888_v32   ;;  %1021 = vperm.xlu0 %2056, %v887_v33   ;;  %v2379_v39 = vpack.c.bf16 %v783_v36, %v782_v35  ;;  %v1435_v32 = vld [vmem:[%s2932_s7 + $0x58] sm:$0xff] }
  0x9c   :  { %v483_v41 = vpop.f32.mrf.mxu1 }
  0x9d   :  { %v252_v37 = vpop.f32.mrf.mxu0  ;;  %v484_v42 = vadd.f32 %v483_v41, %v250_v27 }
  0x9f   :  { %1855 = vmatmul.msk.bf16.gmra.mxu1 %vm414_vm3, %v1999_v38  ;;  %v752_v49 = vadd.f32 %v603_v40, %v484_v42  ;;  %v1440_v42 = vld [vmem:[%s2932_s7 + $0x80] sm:$0xff] }
  0xa1   :  { %v784_v56 = vmax.f32 %v752_v49, 0.0  ;;  %v1442_v49 = vld [vmem:[%s2932_s7 + $0x90] sm:$0xff] }
  0xa2   :  { %1046 = vperm.xlu2 %2058, %v892_v43   ;;  %v1439_v43 = vld [vmem:[%s2932_s7 + $0x78] sm:$0xff] }
  0xa3   :  { %1041 = vperm.xlu1 %2057, %v891_v44   ;;  %1036 = vperm.xlu0 %2056, %v890_v45   ;;  %v1438_v44 = vld [vmem:[%s2932_s7 + $0x70] sm:$0xff]  ;;  %v2020_v45 = vld [vmem:[%s2928_s3 + $0x68] sm:$0xff] }
  0xa4   :  { %v485_v48 = vpop.f32.mrf.mxu1 }
  0xa5   :  { %v255_v47 = vpop.f32.mrf.mxu0  ;;  %v486_v50 = vadd.f32 %v485_v48, %v252_v37  ;;  %v2002_v37 = vld [vmem:[%s2930_s2 + $0x60] sm:$0xff]  ;;  %v1443_v48 = vld [vmem:[%s2932_s7 + $0x98] sm:$0xff] }
  0xa7   :  { %v753_v55 = vadd.f32 %v608_v52, %v486_v50  ;;  %v1441_v50 = vld [vmem:[%s2932_s7 + $0x88] sm:$0xff] }
  0xa8   :  { %1772 = vmatmul.msk.bf16.gmra.mxu0 %vm183_vm2, %v2017_v46 }
  0xa9   :  { %v785_v57 = vmax.f32 %v753_v55, 0.0  ;;  %v1446_v55 = vld [vmem:[%s2932_s7 + $0xb0] sm:$0xff] }
  0xaa   :  { %1463 = vperm.xlu2 %2058, %v1425_v51   ;;  %v14_v51 = vstv %s2933_s8 }
  0xab   :  { %1458 = vperm.xlu1 %2057, %v1424_v53   ;;  %1051 = vperm.xlu0 %2056, %v893_v54   ;;  %v2407_v60 = vpack.c.bf16 %v785_v57, %v784_v56  ;;  %v2003_v53 = vld [vmem:[%s2930_s2 + $0x68] sm:$0xff]  ;;  %15 = vst [vmem:[#allocation2] sm:$0x1] %v14_v51  ;;  %v2509_v56 = vpop.permute.xlu0 %637 }
  0xac   :  { %v488_v62 = vpop.f32.mrf.mxu1  ;;  %v1445_v57 = vld [vmem:[%s2932_s7 + $0xa8] sm:$0xff] }
  0xad   :  { %v257_v58 = vpop.f32.mrf.mxu0  ;;  %v489_v63 = vadd.f32 %v488_v62, %v255_v47 }
  0xaf   :  { %1856 = vmatmul.msk.bf16.gmra.mxu1 %vm414_vm3, %v2000_v59  ;;  %v754_v6 = vadd.f32 %v613_v61, %v489_v63  ;;  %v2518_v59 = vpop.permute.xlu1 %642  ;;  %v2021_v61 = vld [vmem:[%s2928_s3 + $0x70] sm:$0xff] }
  0xb1   :  { %v786_v13 = vmax.f32 %v754_v6, 0.0  ;;  %v2004_v6 = vld [vmem:[%s2930_s2 + $0x70] sm:$0xff] }
  0xb2   :  { %1478 = vperm.xlu2 %2058, %v1428_v0   ;;  %v1449_v0 = vld [vmem:[%s2932_s7 + $0xc8] sm:$0xff] }
  0xb3   :  { %1473 = vperm.xlu1 %2057, %v1427_v1   ;;  %1468 = vperm.xlu0 %2056, %v1426_v2   ;;  %v1448_v1 = vld [vmem:[%s2932_s7 + $0xc0] sm:$0xff]  ;;  %v1447_v2 = vld [vmem:[%s2932_s7 + $0xb8] sm:$0xff] }
  0xb4   :  { %v490_v5 = vpop.f32.mrf.mxu1 }
  0xb5   :  { %v260_v4 = vpop.f32.mrf.mxu0  ;;  %v491_v7 = vadd.f32 %v490_v5, %v257_v58  ;;  %v1444_v58 = vld [vmem:[%s2932_s7 + $0xa0] sm:$0xff] }
  0xb7   :  { %v755_v12 = vadd.f32 %v618_v9, %v491_v7  ;;  %v1451_v9 = vld [vmem:[%s2932_s7 + $0xd8] sm:$0xff] }
  0xb8   :  { %1773 = vmatmul.msk.bf16.gmra.mxu0 %vm183_vm2, %v2018_v3  ;;  %v653_v3 = vpop.permute.xlu0 %652 }
  0xb9   :  { %v787_v14 = vmax.f32 %v755_v12, 0.0  ;;  %v2022_v12 = vld [vmem:[%s2928_s3 + $0x78] sm:$0xff] }
  0xba   :  { %1493 = vperm.xlu2 %2058, %v1431_v8   ;;  %v1452_v8 = vld [vmem:[%s2932_s7 + $0xe0] sm:$0xff] }
  0xbb   :  { %1488 = vperm.xlu1 %2057, %v1430_v10   ;;  %1483 = vperm.xlu0 %2056, %v1429_v11   ;;  %v2435_v17 = vpack.c.bf16 %v787_v14, %v786_v13  ;;  %v1450_v10 = vld [vmem:[%s2932_s7 + $0xd0] sm:$0xff]  ;;  %v633_v11 = vpop.permute.xlu2 %632 }
  0xbc   :  { %v493_v18 = vpop.f32.mrf.mxu1 }
  0xbd   :  { %v262_v15 = vpop.f32.mrf.mxu0  ;;  %v494_v19 = vadd.f32 %v493_v18, %v260_v4  ;;  %v658_v4 = vpop.permute.xlu1 %657  ;;  %v1455_v18 = vld [vmem:[%s2932_s7 + $0xf8] sm:$0xff] }
  0xbf   :  { %1857 = vmatmul.msk.bf16.gmra.mxu1 %vm414_vm3, %v2001_v16  ;;  %v756_v27 = vadd.f32 %v623_v25, %v494_v19  ;;  %v1454_v19 = vld [vmem:[%s2932_s7 + $0xf0] sm:$0xff] }
  0xc0   :  { %v668_v13 = vpop.permute.xlu0 %667 }
  0xc1   :  { %v788_v34 = vmax.f32 %v756_v27, 0.0  ;;  %v1685_v27 = vld [vmem:[#allocation2] sm:$0x1] }
  0xc2   :  { %1508 = vperm.xlu2 %2058, %v1434_v20   ;;  %v1453_v20 = vld [vmem:[%s2932_s7 + $0xe8] sm:$0xff] }
  0xc3   :  { %1503 = vperm.xlu1 %2057, %v1433_v21   ;;  %1498 = vperm.xlu0 %2056, %v1432_v22   ;;  %v648_v21 = vpop.permute.xlu2 %647 }
  0xc4   :  { %v495_v26 = vpop.f32.mrf.mxu1 }
  0xc5   :  { %v265_v24 = vpop.f32.mrf.mxu0  ;;  %v496_v28 = vadd.f32 %v495_v26, %v262_v15  ;;  %v673_v15 = vpop.permute.xlu1 %672 }
  0xc7   :  { %v757_v33 = vadd.f32 %v628_v30, %v496_v28 }
  0xc8   :  { %1774 = vmatmul.msk.bf16.gmra.mxu0 %vm183_vm2, %v2019_v23  ;;  %v2005_v23 = vld [vmem:[%s2930_s2 + $0x78] sm:$0xff] }
  0xc9   :  { %v789_v35 = vmax.f32 %v757_v33, 0.0 }
  0xca   :  { %1523 = vperm.xlu2 %2058, %v1437_v29  }
  0xcb   :  { %1518 = vperm.xlu1 %2057, %v1436_v31   ;;  %1513 = vperm.xlu0 %2056, %v1435_v32   ;;  %v2465_v38 = vpack.c.bf16 %v789_v35, %v788_v34  ;;  %v663_v31 = vpop.permute.xlu2 %662 }
  0xcc   :  { %v498_v40 = vpop.f32.mrf.mxu1 }
  0xcd   :  { %v2460_v36 = vpop.f32.mrf.mxu0  ;;  %v2467_v41 = vadd.f32 %v498_v40, %v265_v24  ;;  %v2562_v24 = vpop.permute.xlu0 %742 }
  0xce   :  { %v2564_v26 = vpop.permute.xlu1 %747 }
  0xcf   :  { %1858 = vmatmul.msk.bf16.gmra.mxu1 %vm414_vm3, %v2002_v37 }
  0xd2   :  { %1538 = vperm.xlu2 %2058, %v1440_v42  }
  0xd3   :  { %1533 = vperm.xlu1 %2057, %v1439_v43   ;;  %1528 = vperm.xlu0 %2056, %v1438_v44  }
  0xd4   :  { %v2484_v47 = vpop.f32.mrf.mxu1 }
  0xd5   :  { %v2482_v46 = vpop.f32.mrf.mxu0  ;;  %v2567_v37 = vpop.permute.xlu0 %737 }
  0xd6   :  { %v2570_v44 = vpop.permute.xlu1 %722 }
  0xd8   :  { %1775 = vmatmul.msk.bf16.gmra.mxu0 %vm183_vm2, %v2020_v45 }
  0xda   :  { %1553 = vperm.xlu2 %2058, %v1443_v48  }
  0xdb   :  { %1548 = vperm.xlu1 %2057, %v1442_v49   ;;  %1543 = vperm.xlu0 %2056, %v1441_v50  }
  0xdc   :  { %v2504_v54 = vpop.f32.mrf.mxu1 }
  0xdd   :  { %v2499_v52 = vpop.f32.mrf.mxu0  ;;  %v504_v45 = vadd.f32 %v2504_v54, %v2482_v46 }
  0xdf   :  { %1859 = vmatmul.msk.bf16.gmra.mxu1 %vm414_vm3, %v2003_v53  ;;  %v501_v53 = vadd.f32 %v2484_v47, %v2460_v36  ;;  %v2581_v36 = vpop.permute.xlu1 %717 }
  0xe2   :  { %1568 = vperm.xlu2 %2058, %v1446_v55  }
  0xe3   :  { %1563 = vperm.xlu1 %2057, %v1445_v57   ;;  %1558 = vperm.xlu0 %2056, %v1444_v58  }
  0xe4   :  { %v505_v63 = vpop.f32.mrf.mxu1 }
  0xe5   :  { %v275_v62 = vpop.f32.mrf.mxu0  ;;  %v506_v40 = vadd.f32 %v505_v63, %v2499_v52  ;;  %v760_v52 = vadd.f32 %v2518_v59, %v504_v45 }
  0xe7   :  { %v761_v55 = vadd.f32 %v648_v21, %v506_v40 }
  0xe8   :  { %1776 = vmatmul.msk.bf16.gmra.mxu0 %vm183_vm2, %v2021_v61 }
  0xe9   :  { %v793_v46 = vmax.f32 %v761_v55, 0.0 }
  0xea   :  { %1583 = vperm.xlu2 %2058, %v1449_v0   ;;  %v678_v0 = vpop.permute.xlu2 %677 }
  0xeb   :  { %1578 = vperm.xlu1 %2057, %v1448_v1   ;;  %1573 = vperm.xlu0 %2056, %v1447_v2   ;;  %v759_v1 = vadd.f32 %v2509_v56, %v501_v53  ;;  %v2578_v2 = vpop.permute.xlu0 %712 }
  0xec   :  { %v508_v7 = vpop.f32.mrf.mxu1 }
  0xed   :  { %v277_v5 = vpop.f32.mrf.mxu0  ;;  %v509_v33 = vadd.f32 %v508_v7, %v275_v62 }
  0xef   :  { %1860 = vmatmul.msk.bf16.gmra.mxu1 %vm414_vm3, %v2004_v6  ;;  %v762_v48 = vadd.f32 %v653_v3, %v509_v33  ;;  %v758_v3 = vadd.f32 %v633_v11, %v2467_v41 }
  0xf1   :  { %v794_v62 = vmax.f32 %v762_v48, 0.0  ;;  %v790_v7 = vmax.f32 %v758_v3, 0.0  ;;  %v2028_v3 = vld [vmem:[%s2934_s5 + $0x24] sm:$0xf0] }
  0xf2   :  { %1598 = vperm.xlu2 %2058, %v1452_v8  }
  0xf3   :  { %1593 = vperm.xlu1 %2057, %v1451_v9   ;;  %1588 = vperm.xlu0 %2056, %v1450_v10   ;;  %v708_v41 = vpop.permute.xlu0 %707 }
  0xf4   :  { %v510_v16 = vpop.f32.mrf.mxu1 }
  0xf5   :  { %v280_v14 = vpop.f32.mrf.mxu0  ;;  %v511_v30 = vadd.f32 %v510_v16, %v277_v5  ;;  %v791_v5 = vmax.f32 %v759_v1, 0.0 }
  0xf7   :  { %v763_v42 = vadd.f32 %v658_v4, %v511_v30  ;;  %v792_v4 = vmax.f32 %v760_v52, 0.0  ;;  %v850_v56 = vpack.c.bf16 %v791_v5, %v790_v7 }
  0xf8   :  { %1777 = vmatmul.msk.bf16.gmra.mxu0 %vm183_vm2, %v2022_v12  ;;  %v2583_v12 = vpop.permute.xlu2 %732 }
  0xf9   :  { %v795_v57 = vmax.f32 %v763_v42, 0.0  ;;  %v851_v6 = vpack.c.bf16 %v793_v46, %v792_v4 }
  0xfa   :  { %1613 = vperm.xlu2 %2058, %v1455_v18   ;;  %v693_v18 = vpop.permute.xlu1 %692 }
  0xfb   :  { %1608 = vperm.xlu1 %2057, %v1454_v19   ;;  %1603 = vperm.xlu0 %2056, %v1453_v20   ;;  %v852_v54 = vpack.c.bf16 %v795_v57, %v794_v62 }
  0xfc   :  { %v513_v25 = vpop.f32.mrf.mxu1 }
  0xfd   :  { %v282_v22 = vpop.f32.mrf.mxu0  ;;  %v514_v28 = vadd.f32 %v513_v25, %v280_v14 }
  0xff   :  { %1861 = vmatmul.msk.bf16.gmra.mxu1 %vm414_vm3, %v2005_v23  ;;  %v764_v35 = vadd.f32 %v663_v31, %v514_v28  ;;  %v1864_v28 = vld [vmem:[%s2934_s5] sm:$0xf] }
 0x101   :  { %v796_v49 = vmax.f32 %v764_v35, 0.0 }
 0x103   :  { %1688 = vperm.xlu0 %2056, %v1685_v27  }
 0x104   :  { %v515_v32 = vpop.f32.mrf.mxu1 }
 0x105   :  { %v285_v29 = vpop.f32.mrf.mxu0  ;;  %v516_v34 = vadd.f32 %v515_v32, %v282_v22  ;;  %v683_v22 = vpop.permute.xlu0 %682 }
 0x107   :  { %v765_v43 = vadd.f32 %v668_v13, %v516_v34 }
 0x109   :  { %v797_v50 = vmax.f32 %v765_v43, 0.0 }
 0x10b   :  { %v853_v58 = vpack.c.bf16 %v797_v50, %v796_v49  ;;  %v1872_v49 = vld [vmem:[%s2934_s5 + $0x10] sm:$0xf]  ;;  %v2026_v50 = vld [vmem:[%s2934_s5 + $0x14] sm:$0xf0] }
 0x10c   :  { %v518_v61 = vpop.f32.mrf.mxu1  ;;  %v1873_v53 = vor.u32 %v2026_v50, %v1872_v49 }
 0x10d   :  { %v287_v51 = vpop.f32.mrf.mxu0  ;;  %v519_v63 = vadd.f32 %v518_v61, %v285_v29  ;;  %1214 = vmatpush.bf16.msra.mxu2 %v853_v58  ;;  %v2024_v29 = vld [vmem:[%s2934_s5 + $0x4] sm:$0xf0] }
 0x10f   :  { %v766_v8 = vadd.f32 %v673_v15, %v519_v63  ;;  %v2589_v15 = vpop.permute.xlu2 %727 }
 0x111   :  { %1215 = vmatpush.bf16.msra.mxu2 %v852_v54  ;;  %v798_v13 = vmax.f32 %v766_v8, 0.0  ;;  %v1880_v54 = vld [vmem:[%s2934_s5 + $0x20] sm:$0xf] }
 0x114   :  { %v520_v59 = vpop.f32.mrf.mxu1 }
 0x115   :  { %v290_v47 = vpop.f32.mrf.mxu0  ;;  %v521_v9 = vadd.f32 %v520_v59, %v287_v51  ;;  %1216 = vmatpush.bf16.msra.mxu2 %v851_v6 }
 0x117   :  { %v767_v10 = vadd.f32 %v678_v0, %v521_v9  ;;  %v703_v35 = vpop.permute.xlu2 %702 }
 0x119   :  { %v799_v14 = vmax.f32 %v767_v10, 0.0  ;;  %1217 = vmatpush.bf16.msra.mxu2 %v850_v56 }
 0x11b   :  { %v2585_v16 = vpack.c.bf16 %v799_v14, %v798_v13  ;;  %v1888_v13 = vld [vmem:[%s2934_s5 + $0x30] sm:$0xf]  ;;  %v2030_v14 = vld [vmem:[%s2934_s5 + $0x34] sm:$0xf0] }
 0x11c   :  { %v523_v19 = vpop.f32.mrf.mxu1 }
 0x11d   :  { %v292_v11 = vpop.f32.mrf.mxu0  ;;  %v524_v20 = vadd.f32 %v523_v19, %v290_v47  ;;  %1218 = vmatpush.bf16.msra.mxu2 %v2465_v38  ;;  %v688_v38 = vpop.permute.xlu1 %687  ;;  %v1881_v47 = vor.u32 %v2028_v3, %v1880_v54 }
 0x11f   :  { %v768_v25 = vadd.f32 %v683_v22, %v524_v20  ;;  %v1896_v20 = vld [vmem:[%s2934_s5 + $0x40] sm:$0xf] }
 0x121   :  { %1219 = vmatpush.bf16.msra.mxu2 %v2435_v17  ;;  %v1865_v17 = vor.u32 %v2024_v29, %v1864_v28  ;;  %v800_v31 = vmax.f32 %v768_v25, 0.0  ;;  %v1904_v29 = vld [vmem:[%s2934_s5 + $0x50] sm:$0xf] }
 0x124   :  { %v525_v23 = vpop.f32.mrf.mxu1 }
 0x125   :  { %v295_v21 = vpop.f32.mrf.mxu0  ;;  %v526_v27 = vadd.f32 %v525_v23, %v292_v11  ;;  %1220 = vmatpush.bf16.msra.mxu2 %v2407_v60 }
 0x127   :  { %v769_v30 = vadd.f32 %v688_v38, %v526_v27  ;;  %v2034_v38 = vld [vmem:[%s2934_s5 + $0x54] sm:$0xf0] }
 0x129   :  { %v801_v32 = vmax.f32 %v769_v30, 0.0  ;;  %1221 = vmatpush.bf16.msra.mxu2 %v2379_v39  ;;  %v698_v39 = vpop.permute.xlu2 %697  ;;  %v1905_v30 = vor.u32 %v2034_v38, %v1904_v29 }
 0x12b   :  { %v2599_v34 = vpack.c.bf16 %v801_v32, %v800_v31 }
 0x12c   :  { %v528_v60 = vpop.f32.mrf.mxu1  ;;  %1222 = vmatmul.bf16.vlgmr.msra.gmra.mxu2 %v1865_v17 }
 0x12d   :  { %v297_v33 = vpop.f32.mrf.mxu0  ;;  %v529_v40 = vadd.f32 %v528_v60, %v295_v21  ;;  %v2032_v21 = vld [vmem:[%s2934_s5 + $0x44] sm:$0xf0] }
 0x12e   :  { %v1897_v23 = vor.u32 %v2032_v21, %v1896_v20 }
 0x12f   :  { %v770_v45 = vadd.f32 %v693_v18, %v529_v40 }
 0x131   :  { %v802_v55 = vmax.f32 %v770_v45, 0.0  ;;  %v2036_v45 = vld [vmem:[%s2934_s5 + $0x64] sm:$0xf0]  ;;  %v2695_v21 = vpop.permute.xlu2 %896 }
 0x134   :  { %v530_v43 = vpop.f32.mrf.mxu1 }
 0x135   :  { %v300_v42 = vpop.f32.mrf.mxu0  ;;  %v531_v48 = vadd.f32 %v530_v43, %v297_v33  ;;  %v1912_v43 = vld [vmem:[%s2934_s5 + $0x60] sm:$0xf] }
 0x137   :  { %v771_v51 = vadd.f32 %v698_v39, %v531_v48 }
 0x139   :  { %v803_v57 = vmax.f32 %v771_v51, 0.0  ;;  %v1913_v51 = vor.u32 %v2036_v45, %v1912_v43  ;;  %v2713_v38 = vpop.permute.xlu2 %911  ;;  %v2031_v43 = vld [vmem:[%s2934_s5 + $0x44] sm:$0xf]  ;;  %v1898_v45 = vld [vmem:[%s2934_s5 + $0x48] sm:$0xf0] }
 0x13b   :  { %v2607_v61 = vpack.c.bf16 %v803_v57, %v802_v55 }
 0x13c   :  { %v533_v52 = vpop.f32.mrf.mxu1  ;;  %1227 = vmatmul.bf16.gmra.mxu2 %v1873_v53 }
 0x13d   :  { %v302_v58 = vpop.f32.mrf.mxu0  ;;  %v534_v62 = vadd.f32 %v533_v52, %v300_v42 }
 0x13f   :  { %v772_v1 = vadd.f32 %v703_v35, %v534_v62 }
 0x141   :  { %v804_v5 = vmax.f32 %v772_v1, 0.0 }
 0x144   :  { %v535_v0 = vpop.f32.mrf.mxu1 }
 0x145   :  { %v305_v63 = vpop.f32.mrf.mxu0  ;;  %v536_v46 = vadd.f32 %v535_v0, %v302_v58 }
 0x147   :  { %v773_v4 = vadd.f32 %v708_v41, %v536_v46  ;;  %v1889_v41 = vor.u32 %v2030_v14, %v1888_v13  ;;  %v1944_v14 = vld [vmem:[%s2934_s5 + $0xa0] sm:$0xf] }
 0x149   :  { %v805_v6 = vmax.f32 %v773_v4, 0.0 }
 0x14b   :  { %v2615_v7 = vpack.c.bf16 %v805_v6, %v804_v5  ;;  %v2040_v6 = vld [vmem:[%s2934_s5 + $0x84] sm:$0xf0] }
 0x14c   :  { %v538_v8 = vpop.f32.mrf.mxu1  ;;  %1232 = vmatmul.bf16.gmra.mxu2 %v1881_v47 }
 0x14d   :  { %v307_v59 = vpop.f32.mrf.mxu0  ;;  %v539_v9 = vadd.f32 %v538_v8, %v305_v63 }
 0x14f   :  { %v774_v54 = vadd.f32 %v2578_v2, %v539_v9  ;;  %v1928_v2 = vld [vmem:[%s2934_s5 + $0x80] sm:$0xf]  ;;  %v2042_v9 = vld [vmem:[%s2934_s5 + $0x94] sm:$0xf0] }
 0x150   :  { %v1929_v8 = vor.u32 %v2040_v6, %v1928_v2 }
 0x151   :  { %v806_v47 = vmax.f32 %v774_v54, 0.0 }
 0x154   :  { %v540_v56 = vpop.f32.mrf.mxu1 }
 0x155   :  { %v310_v10 = vpop.f32.mrf.mxu0  ;;  %v541_v52 = vadd.f32 %v540_v56, %v307_v59  ;;  %v2023_v59 = vld [vmem:[%s2934_s5 + $0x4] sm:$0xf]  ;;  %v1874_v56 = vld [vmem:[%s2934_s5 + $0x18] sm:$0xf0] }
 0x15c   :  { %v543_v18 = vpop.f32.mrf.mxu1  ;;  %1237 = vmatmul.bf16.gmra.mxu2 %v1889_v41  ;;  %v2044_v41 = vld [vmem:[%s2934_s5 + $0xa4] sm:$0xf0] }
 0x15d   :  { %v312_v11 = vpop.f32.mrf.mxu0  ;;  %v544_v53 = vadd.f32 %v543_v18, %v310_v10  ;;  %v2025_v10 = vld [vmem:[%s2934_s5 + $0x14] sm:$0xf]  ;;  %v1882_v18 = vld [vmem:[%s2934_s5 + $0x28] sm:$0xf0] }
 0x15f   :  { %v776_v1 = vadd.f32 %v2570_v44, %v544_v53  ;;  %v2038_v44 = vld [vmem:[%s2934_s5 + $0x74] sm:$0xf0] }
 0x161   :  { %v808_v3 = vmax.f32 %v776_v1, 0.0  ;;  %v1906_v1 = vld [vmem:[%s2934_s5 + $0x58] sm:$0xf0] }
 0x164   :  { %v545_v19 = vpop.f32.mrf.mxu1 }
 0x165   :  { %v315_v22 = vpop.f32.mrf.mxu0  ;;  %v546_v49 = vadd.f32 %v545_v19, %v312_v11  ;;  %v2027_v11 = vld [vmem:[%s2934_s5 + $0x24] sm:$0xf]  ;;  %v1945_v19 = vor.u32 %v2044_v41, %v1944_v14 }
 0x166   :  { %v1885_v20 = vor.u32 %v2027_v11, %v1882_v18 }
 0x167   :  { %v777_v62 = vadd.f32 %v2589_v15, %v546_v49  ;;  %v1920_v15 = vld [vmem:[%s2934_s5 + $0x70] sm:$0xf]  ;;  %v1901_v49 = vor.u32 %v2031_v43, %v1898_v45 }
 0x169   :  { %v809_v46 = vmax.f32 %v777_v62, 0.0 }
 0x16b   :  { %v859_v4 = vpack.c.bf16 %v809_v46, %v808_v3 }
 0x16c   :  { %v548_v25 = vpop.f32.mrf.mxu1  ;;  %1242 = vmatmul.bf16.gmra.mxu2 %v1897_v23  ;;  %v2700_v23 = vpop.permute.xlu0 %901 }
 0x16d   :  { %v317_v27 = vpop.f32.mrf.mxu0  ;;  %v549_v40 = vadd.f32 %v548_v25, %v315_v22  ;;  %v1952_v22 = vld [vmem:[%s2934_s5 + $0xb0] sm:$0xf]  ;;  %v2046_v25 = vld [vmem:[%s2934_s5 + $0xb4] sm:$0xf0] }
 0x16f   :  { %v778_v55 = vadd.f32 %v2583_v12, %v549_v40  ;;  %v1960_v40 = vld [vmem:[%s2934_s5 + $0xc0] sm:$0xf] }
 0x174   :  { %v550_v28 = vpop.f32.mrf.mxu1 }
 0x175   :  { %v320_v17 = vpop.f32.mrf.mxu0  ;;  %v551_v33 = vadd.f32 %v550_v28, %v317_v27  ;;  %v2029_v27 = vld [vmem:[%s2934_s5 + $0x34] sm:$0xf]  ;;  %v1890_v28 = vld [vmem:[%s2934_s5 + $0x38] sm:$0xf0] }
 0x177   :  { %v779_v50 = vadd.f32 %v2567_v37, %v551_v33  ;;  %v775_v37 = vadd.f32 %v2581_v36, %v541_v52  ;;  %v1921_v36 = vor.u32 %v2038_v44, %v1920_v15  ;;  %v1914_v15 = vld [vmem:[%s2934_s5 + $0x68] sm:$0xf0] }
 0x179   :  { %v811_v63 = vmax.f32 %v779_v50, 0.0  ;;  %v807_v12 = vmax.f32 %v775_v37, 0.0 }
 0x17b   :  { %v858_v5 = vpack.c.bf16 %v807_v12, %v806_v47  ;;  %v1976_v12 = vld [vmem:[%s2934_s5 + $0xe0] sm:$0xf]  ;;  %v2035_v47 = vld [vmem:[%s2934_s5 + $0x64] sm:$0xf] }
 0x17c   :  { %v553_v31 = vpop.f32.mrf.mxu1  ;;  %1247 = vmatmul.bf16.gmra.mxu2 %v1905_v30  ;;  %v2715_v30 = vpop.permute.xlu1 %906  ;;  %v1917_v2 = vor.u32 %v2035_v47, %v1914_v15 }
 0x17d   :  { %v554_v32 = vadd.f32 %v553_v31, %v320_v17  ;;  %v322_v35 = vpop.f32.mrf.mxu0  ;;  %v1953_v17 = vor.u32 %v2046_v25, %v1952_v22  ;;  %v1893_v31 = vor.u32 %v2029_v27, %v1890_v28  ;;  %v2039_v22 = vld [vmem:[%s2934_s5 + $0x84] sm:$0xf]  ;;  %v1930_v25 = vld [vmem:[%s2934_s5 + $0x88] sm:$0xf0] }
 0x17f   :  { %v780_v48 = vadd.f32 %v2562_v24, %v554_v32  ;;  %v810_v24 = vmax.f32 %v778_v55, 0.0  ;;  %v2717_v32 = vpop.permute.xlu0 %916 }
 0x181   :  { %v812_v57 = vmax.f32 %v780_v48, 0.0 }
 0x184   :  { %v555_v60 = vpop.f32.mrf.mxu1 }
 0x185   :  { %v556_v42 = vadd.f32 %v555_v60, %v322_v35  ;;  %v2721_v35 = vpop.permute.xlu2 %926  ;;  %v2723_v60 = vpop.permute.xlu1 %921 }
 0x187   :  { %v781_v39 = vadd.f32 %v2564_v26, %v556_v42  ;;  %v860_v26 = vpack.c.bf16 %v811_v63, %v810_v24  ;;  %v2048_v42 = vld [vmem:[%s2934_s5 + $0xc4] sm:$0xf0]  ;;  %v2737_v50 = vpop.permute.xlu0 %931  ;;  %v2050_v63 = vld [vmem:[%s2934_s5 + $0xd4] sm:$0xf0] }
 0x188   :  { %v1961_v48 = vor.u32 %v2048_v42, %v1960_v40 }
 0x189   :  { %v813_v58 = vmax.f32 %v781_v39, 0.0 }
 0x18b   :  { %v861_v0 = vpack.c.bf16 %v813_v58, %v812_v57  ;;  %v1968_v58 = vld [vmem:[%s2934_s5 + $0xd0] sm:$0xf] }
 0x18c   :  { %1252 = vmatmul.bf16.gmra.mxu2 %v1913_v51  ;;  %v1969_v24 = vor.u32 %v2050_v63, %v1968_v58  ;;  %v1938_v58 = vld [vmem:[%s2934_s5 + $0x98] sm:$0xf0] }
 0x18d   :  { %1303 = vmatpush.bf16.msra.mxu3 %v861_v0  ;;  %v2741_v51 = vpop.permute.xlu2 %941  ;;  %v2743_v53 = vpop.permute.xlu1 %936  ;;  %v2033_v0 = vld [vmem:[%s2934_s5 + $0x54] sm:$0xf] }
 0x18e   :  { %v1909_v37 = vor.u32 %v2033_v0, %v1906_v1 }
 0x18f   :  { %v2745_v55 = vpop.permute.xlu0 %946 }
 0x191   :  { %1304 = vmatpush.bf16.msra.mxu3 %v860_v26 }
 0x195   :  { %1305 = vmatpush.bf16.msra.mxu3 %v859_v4  ;;  %v2752_v52 = vpop.permute.xlu2 %956  ;;  %v2754_v62 = vpop.permute.xlu1 %951  ;;  %v2052_v4 = vld [vmem:[%s2934_s5 + $0xe4] sm:$0xf0] }
 0x197   :  { %v2765_v46 = vpop.permute.xlu0 %961 }
 0x199   :  { %1306 = vmatpush.bf16.msra.mxu3 %v858_v5 }
 0x19c   :  { %1257 = vmatmul.bf16.gmra.mxu2 %v1921_v36  ;;  %v1977_v36 = vor.u32 %v2052_v4, %v1976_v12 }
 0x19d   :  { %1307 = vmatpush.bf16.msra.mxu3 %v2615_v7  ;;  %v1866_v7 = vld [vmem:[%s2934_s5 + $0x8] sm:$0xf0]  ;;  %v2769_v54 = vpop.permute.xlu2 %971  ;;  %v2771_v3 = vpop.permute.xlu1 %966 }
 0x19f   :  { %v2785_v44 = vpop.permute.xlu0 %976 }
 0x1a1   :  { %1308 = vmatpush.bf16.msra.mxu3 %v2607_v61  ;;  %v1869_v61 = vor.u32 %v2023_v59, %v1866_v7 }
 0x1a5   :  { %1309 = vmatpush.bf16.msra.mxu3 %v2599_v34  ;;  %v1936_v34 = vld [vmem:[%s2934_s5 + $0x90] sm:$0xf]  ;;  %v2789_v6 = vpop.permute.xlu2 %986  ;;  %v2791_v59 = vpop.permute.xlu1 %981 }
 0x1a6   :  { %v1937_v13 = vor.u32 %v2042_v9, %v1936_v34  ;;  %v1984_v9 = vld [vmem:[%s2934_s5 + $0xf0] sm:$0xf] }
 0x1a7   :  { %v2793_v7 = vpop.permute.xlu0 %991 }
 0x1a9   :  { %1310 = vmatpush.bf16.msra.mxu3 %v2585_v16  ;;  %v1877_v16 = vor.u32 %v2025_v10, %v1874_v56  ;;  %v2054_v10 = vld [vmem:[%s2934_s5 + $0xf4] sm:$0xf0]  ;;  %v2037_v56 = vld [vmem:[%s2934_s5 + $0x74] sm:$0xf] }
 0x1ac   :  { %1262 = vmatmul.bf16.gmra.mxu2 %v1929_v8  ;;  %1311 = vmatmul.bf16.vlgmr.msra.gmra.mxu3 %v1869_v61 }
 0x1ad   :  { %v2797_v61 = vpop.permute.xlu2 %1001  ;;  %v2799_v34 = vpop.permute.xlu1 %996 }
 0x1af   :  { %v2711_v29 = vpop.f32.mrf.mxu2  ;;  %v2813_v41 = vpop.permute.xlu0 %1006 }
 0x1b5   :  { %v2817_v18 = vpop.permute.xlu2 %1016 }
 0x1b7   :  { %v2719_v33 = vpop.f32.mrf.mxu2 }
 0x1b8   :  { %v1226_v63 = vadd.f32 %v2719_v33, %v2700_v23 }
 0x1bc   :  { %1267 = vmatmul.bf16.gmra.mxu2 %v1937_v13  ;;  %1316 = vmatmul.bf16.gmra.mxu3 %v1877_v16  ;;  %v1922_v13 = vld [vmem:[%s2934_s5 + $0x78] sm:$0xf0]  ;;  %v1985_v16 = vor.u32 %v2054_v10, %v1984_v9 }
 0x1bd   :  { %v1925_v14 = vor.u32 %v2037_v56, %v1922_v13  ;;  %v2829_v27 = vpop.permute.xlu2 %1031 }
 0x1bf   :  { %v2739_v39 = vpop.f32.mrf.mxu2 }
 0x1c5   :  { %v2837_v45 = vpop.permute.xlu2 %1046 }
 0x1c7   :  { %v2747_v57 = vpop.f32.mrf.mxu2 }
 0x1cc   :  { %1272 = vmatmul.bf16.gmra.mxu2 %v1945_v19  ;;  %1321 = vmatmul.bf16.gmra.mxu3 %v1885_v20  ;;  %v2819_v19 = vpop.permute.xlu1 %1011  ;;  %v2821_v20 = vpop.permute.xlu0 %1021 }
 0x1cd   :  { %v1464_v12 = vpop.permute.xlu2 %1463 }
 0x1cf   :  { %v2767_v26 = vpop.f32.mrf.mxu2 }
 0x1d4   :  { %v2831_v28 = vpop.permute.xlu1 %1026  ;;  %v2835_v40 = vpop.permute.xlu0 %1036 }
 0x1d7   :  { %v2787_v5 = vpop.f32.mrf.mxu2 }
 0x1dc   :  { %1277 = vmatmul.bf16.gmra.mxu2 %v1953_v17  ;;  %1326 = vmatmul.bf16.gmra.mxu3 %v1893_v31  ;;  %v1933_v17 = vor.u32 %v2039_v22, %v1930_v25  ;;  %v1224_v31 = vadd.f32 %v2711_v29, %v2695_v21  ;;  %v1231_v22 = vadd.f32 %v2747_v57, %v2713_v38  ;;  %v2045_v38 = vld [vmem:[%s2934_s5 + $0xb4] sm:$0xf]  ;;  %v1954_v57 = vld [vmem:[%s2934_s5 + $0xb8] sm:$0xf0] }
 0x1df   :  { %v2795_v8 = vpop.f32.mrf.mxu2 }
 0x1e7   :  { %v2815_v11 = vpop.f32.mrf.mxu2 }
 0x1ec   :  { %1282 = vmatmul.bf16.gmra.mxu2 %v1961_v48  ;;  %1331 = vmatmul.bf16.gmra.mxu3 %v1901_v49  ;;  %v2839_v48 = vpop.permute.xlu1 %1041  ;;  %v2041_v49 = vld [vmem:[%s2934_s5 + $0x94] sm:$0xf] }
 0x1ed   :  { %v1941_v1 = vor.u32 %v2041_v49, %v1938_v58  ;;  %v1234_v58 = vadd.f32 %v2767_v26, %v2717_v32 }
 0x1f4   :  { %v1459_v4 = vpop.permute.xlu1 %1458 }
 0x1fc   :  { %1287 = vmatmul.bf16.gmra.mxu2 %v1969_v24  ;;  %1336 = vmatmul.bf16.gmra.mxu3 %v1909_v37  ;;  %v2849_v24 = vpop.permute.xlu0 %1051 }
 0x204   :  { %v1469_v33 = vpop.permute.xlu0 %1468 }
 0x20c   :  { %1292 = vmatmul.bf16.gmra.mxu2 %v1977_v36  ;;  %1341 = vmatmul.bf16.gmra.mxu3 %v1917_v2  ;;  %v1243_v36 = vpop.f32.mrf.mxu2  ;;  %v1229_v2 = vadd.f32 %v2739_v39, %v2715_v30 }
 0x21c   :  { %1297 = vmatmul.bf16.gmra.mxu2 %v1985_v16  ;;  %1346 = vmatmul.bf16.gmra.mxu3 %v1925_v14  ;;  %v2043_v16 = vld [vmem:[%s2934_s5 + $0xa4] sm:$0xf]  ;;  %v1946_v14 = vld [vmem:[%s2934_s5 + $0xa8] sm:$0xf0] }
 0x22c   :  { %1351 = vmatmul.bf16.gmra.mxu3 %v1933_v17  ;;  %v1245_v17 = vpop.f32.mrf.mxu2 }
 0x22f   :  { %v1312_v42 = vpop.f32.mrf.mxu3 }
 0x230   :  { %v1313_v43 = vadd.f32 %v1312_v42, %v1224_v31  ;;  %v1949_v31 = vor.u32 %v2043_v16, %v1946_v14 }
 0x232   :  { %v1392_v29 = vmax.f32 %v1313_v43, 0.0  ;;  %v1474_v43 = vpop.permute.xlu1 %1473 }
 0x234   :  { %v1616_v47 = vmul.f32 %v1459_v4, %v1392_v29  ;;  %v1236_v4 = vadd.f32 %v2787_v5, %v2723_v60  ;;  %v2047_v60 = vld [vmem:[%s2934_s5 + $0xc4] sm:$0xf]  ;;  %v1962_v5 = vld [vmem:[%s2934_s5 + $0xc8] sm:$0xf0] }
 0x237   :  { %v1314_v21 = vpop.f32.mrf.mxu3 }
 0x238   :  { %v1315_v0 = vadd.f32 %v1314_v21, %v1226_v63 }
 0x23a   :  { %v1393_v37 = vmax.f32 %v1315_v0, 0.0  ;;  %v1248_v0 = vpop.f32.mrf.mxu2 }
 0x23c   :  { %v1617_v15 = vmul.f32 %v1464_v12, %v1393_v37  ;;  %1356 = vmatmul.bf16.gmra.mxu3 %v1941_v1  ;;  %v1479_v37 = vpop.permute.xlu2 %1478 }
 0x23e   :  { %v1648_v9 = vadd.f32 %v1617_v15, %v1616_v47  ;;  %v1957_v15 = vor.u32 %v2045_v38, %v1954_v57 }
 0x23f   :  { %v1317_v10 = vpop.f32.mrf.mxu3 }
 0x240   :  { %v1318_v56 = vadd.f32 %v1317_v10, %v1229_v2 }
 0x242   :  { %v1394_v23 = vmax.f32 %v1318_v56, 0.0  ;;  %v1250_v10 = vpop.f32.mrf.mxu2 }
 0x244   :  { %v1618_v13 = vmul.f32 %v1469_v33, %v1394_v23  ;;  %v1239_v23 = vadd.f32 %v2795_v8, %v2721_v35 }
 0x246   :  { %v1649_v25 = vadd.f32 %v1648_v9, %v1618_v13  ;;  %v1484_v9 = vpop.permute.xlu0 %1483 }
 0x247   :  { %v1319_v30 = vpop.f32.mrf.mxu3 }
 0x248   :  { %v1320_v39 = vadd.f32 %v1319_v30, %v1231_v22  ;;  %v1489_v22 = vpop.permute.xlu1 %1488 }
 0x24a   :  { %v1395_v42 = vmax.f32 %v1320_v39, 0.0  ;;  %v1253_v30 = vpop.f32.mrf.mxu2  ;;  %v1241_v39 = vadd.f32 %v2815_v11, %v2737_v50  ;;  %v2049_v50 = vld [vmem:[%s2934_s5 + $0xd4] sm:$0xf]  ;;  %v1970_v11 = vld [vmem:[%s2934_s5 + $0xd8] sm:$0xf0] }
 0x24c   :  { %v1619_v49 = vmul.f32 %v1474_v43, %v1395_v42  ;;  %1361 = vmatmul.bf16.gmra.mxu3 %v1949_v31  ;;  %v1965_v42 = vor.u32 %v2047_v60, %v1962_v5  ;;  %v1251_v60 = vadd.f32 %v1250_v10, %v2754_v62  ;;  %v2053_v62 = vld [vmem:[%s2934_s5 + $0xf4] sm:$0xf]  ;;  %v1986_v10 = vld [vmem:[%s2934_s5 + $0xf8] sm:$0xf0] }
 0x24e   :  { %v1650_v63 = vadd.f32 %v1649_v25, %v1619_v49  ;;  %v1494_v49 = vpop.permute.xlu2 %1493  ;;  %v1499_v38 = vpop.permute.xlu0 %1498 }
 0x24f   :  { %v1322_v21 = vpop.f32.mrf.mxu3 }
 0x250   :  { %v1323_v29 = vadd.f32 %v1322_v21, %v1234_v58 }
 0x252   :  { %v1396_v1 = vmax.f32 %v1323_v29, 0.0  ;;  %v1255_v29 = vpop.f32.mrf.mxu2 }
 0x254   :  { %v1620_v12 = vmul.f32 %v1479_v37, %v1396_v1 }
 0x256   :  { %v1651_v47 = vadd.f32 %v1650_v63, %v1620_v12  ;;  %v1244_v63 = vadd.f32 %v1243_v36, %v2743_v53  ;;  %v1973_v36 = vor.u32 %v2049_v50, %v1970_v11 }
 0x257   :  { %v1324_v32 = vpop.f32.mrf.mxu3 }
 0x258   :  { %v1325_v26 = vadd.f32 %v1324_v32, %v1236_v4  ;;  %v1246_v4 = vadd.f32 %v1245_v17, %v2741_v51  ;;  %v2051_v51 = vld [vmem:[%s2934_s5 + $0xe4] sm:$0xf]  ;;  %v1978_v17 = vld [vmem:[%s2934_s5 + $0xe8] sm:$0xf0] }
 0x25a   :  { %v1397_v2 = vmax.f32 %v1325_v26, 0.0  ;;  %v1258_v26 = vpop.f32.mrf.mxu2 }
 0x25c   :  { %v1621_v56 = vmul.f32 %v1484_v9, %v1397_v2  ;;  %1366 = vmatmul.bf16.gmra.mxu3 %v1957_v15  ;;  %v1504_v2 = vpop.permute.xlu1 %1503 }
 0x25e   :  { %v1652_v33 = vadd.f32 %v1651_v47, %v1621_v56  ;;  %v1249_v56 = vadd.f32 %v1248_v0, %v2745_v55  ;;  %v1981_v0 = vor.u32 %v2051_v51, %v1978_v17 }
 0x25f   :  { %v1327_v13 = vpop.f32.mrf.mxu3 }
 0x260   :  { %v1328_v16 = vadd.f32 %v1327_v13, %v1239_v23 }
 0x262   :  { %v1398_v14 = vmax.f32 %v1328_v16, 0.0 }
 0x264   :  { %v1622_v25 = vmul.f32 %v1489_v22, %v1398_v14  ;;  %v1509_v14 = vpop.permute.xlu2 %1508  ;;  %v1260_v22 = vpop.f32.mrf.mxu2 }
 0x266   :  { %v1653_v31 = vadd.f32 %v1652_v33, %v1622_v25 }
 0x267   :  { %v1329_v35 = vpop.f32.mrf.mxu3 }
 0x268   :  { %v1330_v8 = vadd.f32 %v1329_v35, %v1241_v39  ;;  %v1514_v35 = vpop.permute.xlu0 %1513 }
 0x26a   :  { %v1399_v43 = vmax.f32 %v1330_v8, 0.0 }
 0x26c   :  { %v1623_v58 = vmul.f32 %v1494_v49, %v1399_v43  ;;  %1371 = vmatmul.bf16.gmra.mxu3 %v1965_v42  ;;  %v1263_v42 = vpop.f32.mrf.mxu2  ;;  %v1254_v43 = vadd.f32 %v1253_v30, %v2752_v52  ;;  %v1989_v30 = vor.u32 %v2053_v62, %v1986_v10 }
 0x26d   :  { %v1264_v17 = vadd.f32 %v1263_v42, %v2785_v44 }
 0x26e   :  { %v1654_v21 = vadd.f32 %v1653_v31, %v1623_v58 }
 0x26f   :  { %v1332_v1 = vpop.f32.mrf.mxu3 }
 0x270   :  { %v1333_v37 = vadd.f32 %v1332_v1, %v1244_v63  ;;  %v1519_v1 = vpop.permute.xlu1 %1518 }
 0x272   :  { %v1400_v12 = vmax.f32 %v1333_v37, 0.0 }
 0x274   :  { %v1624_v57 = vmul.f32 %v1499_v38, %v1400_v12  ;;  %v1256_v12 = vadd.f32 %v1255_v29, %v2765_v46  ;;  %v1261_v46 = vadd.f32 %v1260_v22, %v2769_v54 }
 0x276   :  { %v1655_v47 = vadd.f32 %v1654_v21, %v1624_v57  ;;  %v1265_v57 = vpop.f32.mrf.mxu2 }
 0x277   :  { %v1334_v32 = vpop.f32.mrf.mxu3 }
 0x278   :  { %v1335_v53 = vadd.f32 %v1334_v32, %v1246_v4  ;;  %v1524_v4 = vpop.permute.xlu2 %1523  ;;  %v1259_v32 = vadd.f32 %v1258_v26, %v2771_v3 }
 0x27a   :  { %v1401_v15 = vmax.f32 %v1335_v53, 0.0 }
 0x27c   :  { %v1625_v9 = vmul.f32 %v1504_v2, %v1401_v15  ;;  %1376 = vmatmul.bf16.gmra.mxu3 %v1973_v36 }
 0x27e   :  { %v1656_v23 = vadd.f32 %v1655_v47, %v1625_v9  ;;  %v1268_v2 = vpop.f32.mrf.mxu2 }
 0x27f   :  { %v1337_v33 = vpop.f32.mrf.mxu3 }
 0x280   :  { %v1338_v13 = vadd.f32 %v1337_v33, %v1249_v56  ;;  %v1529_v56 = vpop.permute.xlu0 %1528 }
 0x282   :  { %v1402_v16 = vmax.f32 %v1338_v13, 0.0 }
 0x284   :  { %v1626_v25 = vmul.f32 %v1509_v14, %v1402_v16  ;;  %v1534_v14 = vpop.permute.xlu1 %1533 }
 0x286   :  { %v1657_v5 = vadd.f32 %v1656_v23, %v1626_v25  ;;  %v1270_v25 = vpop.f32.mrf.mxu2 }
 0x287   :  { %v1339_v39 = vpop.f32.mrf.mxu3  ;;  %v1271_v10 = vadd.f32 %v1270_v25, %v2793_v7 }
 0x288   :  { %v1340_v55 = vadd.f32 %v1339_v39, %v1251_v60  ;;  %v1539_v39 = vpop.permute.xlu2 %1538 }
 0x28a   :  { %v1403_v31 = vmax.f32 %v1340_v55, 0.0 }
 0x28c   :  { %v1627_v8 = vmul.f32 %v1514_v35, %v1403_v31  ;;  %1381 = vmatmul.bf16.gmra.mxu3 %v1981_v0  ;;  %v1266_v31 = vadd.f32 %v1265_v57, %v2791_v59 }
 0x28e   :  { %v1658_v49 = vadd.f32 %v1657_v5, %v1627_v8  ;;  %v1273_v0 = vpop.f32.mrf.mxu2 }
 0x28f   :  { %v1342_v58 = vpop.f32.mrf.mxu3 }
 0x290   :  { %v1343_v63 = vadd.f32 %v1342_v58, %v1254_v43  ;;  %v1544_v43 = vpop.permute.xlu0 %1543  ;;  %v1269_v58 = vadd.f32 %v1268_v2, %v2789_v6 }
 0x292   :  { %v1404_v21 = vmax.f32 %v1343_v63, 0.0 }
 0x294   :  { %v1628_v37 = vmul.f32 %v1519_v1, %v1404_v21 }
 0x296   :  { %v1659_v38 = vadd.f32 %v1658_v49, %v1628_v37  ;;  %v1275_v21 = vpop.f32.mrf.mxu2  ;;  %v1549_v37 = vpop.permute.xlu1 %1548 }
 0x297   :  { %v1344_v50 = vpop.f32.mrf.mxu3 }
 0x298   :  { %v1345_v52 = vadd.f32 %v1344_v50, %v1256_v12 }
 0x29a   :  { %v1405_v11 = vmax.f32 %v1345_v52, 0.0  ;;  %v1554_v52 = vpop.permute.xlu2 %1553 }
 0x29c   :  { %v1629_v47 = vmul.f32 %v1524_v4, %v1405_v11  ;;  %1386 = vmatmul.bf16.gmra.mxu3 %v1989_v30  ;;  %v1274_v11 = vadd.f32 %v1273_v0, %v2799_v34 }
 0x29e   :  { %v1660_v53 = vadd.f32 %v1659_v38, %v1629_v47  ;;  %v1278_v57 = vpop.f32.mrf.mxu2 }
 0x29f   :  { %v1347_v36 = vpop.f32.mrf.mxu3 }
 0x2a0   :  { %v1348_v15 = vadd.f32 %v1347_v36, %v1259_v32 }
 0x2a2   :  { %v1406_v9 = vmax.f32 %v1348_v15, 0.0 }
 0x2a4   :  { %v1630_v23 = vmul.f32 %v1529_v56, %v1406_v9 }
 0x2a6   :  { %v1661_v29 = vadd.f32 %v1660_v53, %v1630_v23  ;;  %v1559_v53 = vpop.permute.xlu0 %1558  ;;  %v1280_v36 = vpop.f32.mrf.mxu2 }
 0x2a7   :  { %v1349_v33 = vpop.f32.mrf.mxu3 }
 0x2a8   :  { %v1350_v13 = vadd.f32 %v1349_v33, %v1261_v46 }
 0x2aa   :  { %v1407_v16 = vmax.f32 %v1350_v13, 0.0 }
 0x2ac   :  { %v1631_v51 = vmul.f32 %v1534_v14, %v1407_v16 }
 0x2ae   :  { %v1662_v60 = vadd.f32 %v1661_v29, %v1631_v51  ;;  %v1283_v56 = vpop.f32.mrf.mxu2  ;;  %v1564_v51 = vpop.permute.xlu1 %1563 }
 0x2af   :  { %v1352_v3 = vpop.f32.mrf.mxu3 }
 0x2b0   :  { %v1353_v26 = vadd.f32 %v1352_v3, %v1264_v17  ;;  %v1276_v17 = vadd.f32 %v1275_v21, %v2797_v61  ;;  %v1279_v3 = vadd.f32 %v1278_v57, %v2813_v41 }
 0x2b2   :  { %v1408_v5 = vmax.f32 %v1353_v26, 0.0 }
 0x2b4   :  { %v1632_v55 = vmul.f32 %v1539_v39, %v1408_v5 }
 0x2b6   :  { %v1663_v35 = vadd.f32 %v1662_v60, %v1632_v55  ;;  %v1285_v23 = vpop.f32.mrf.mxu2  ;;  %v1569_v60 = vpop.permute.xlu2 %1568  ;;  %v1281_v55 = vadd.f32 %v1280_v36, %v2819_v19 }
 0x2b7   :  { %v1354_v54 = vpop.f32.mrf.mxu3 }
 0x2b8   :  { %v1355_v22 = vadd.f32 %v1354_v54, %v1266_v31  ;;  %v1574_v31 = vpop.permute.xlu0 %1573 }
 0x2ba   :  { %v1409_v8 = vmax.f32 %v1355_v22, 0.0 }
 0x2bc   :  { %v1633_v49 = vmul.f32 %v1544_v43, %v1409_v8  ;;  %v1579_v8 = vpop.permute.xlu1 %1578  ;;  %v1286_v43 = vadd.f32 %v1285_v23, %v2821_v20 }
 0x2be   :  { %v1664_v63 = vadd.f32 %v1663_v35, %v1633_v49  ;;  %v1288_v33 = vpop.f32.mrf.mxu2  ;;  %v1284_v35 = vadd.f32 %v1283_v56, %v2817_v18 }
 0x2bf   :  { %v1357_v44 = vpop.f32.mrf.mxu3  ;;  %v1289_v61 = vadd.f32 %v1288_v33, %v2831_v28 }
 0x2c0   :  { %v1358_v42 = vadd.f32 %v1357_v44, %v1269_v58  ;;  %v1584_v44 = vpop.permute.xlu2 %1583  ;;  %v1589_v57 = vpop.permute.xlu0 %1588 }
 0x2c2   :  { %v1410_v1 = vmax.f32 %v1358_v42, 0.0 }
 0x2c4   :  { %v1634_v62 = vmul.f32 %v1549_v37, %v1410_v1 }
 0x2c6   :  { %v1665_v12 = vadd.f32 %v1664_v63, %v1634_v62  ;;  %v1290_v16 = vpop.f32.mrf.mxu2 }
 0x2c7   :  { %v1359_v38 = vpop.f32.mrf.mxu3  ;;  %v1291_v19 = vadd.f32 %v1290_v16, %v2829_v27 }
 0x2c8   :  { %v1360_v59 = vadd.f32 %v1359_v38, %v1271_v10  ;;  %v1599_v56 = vpop.permute.xlu2 %1598  ;;  %v1604_v16 = vpop.permute.xlu0 %1603 }
 0x2ca   :  { %v1411_v50 = vmax.f32 %v1360_v59, 0.0 }
 0x2cc   :  { %v1635_v30 = vmul.f32 %v1554_v52, %v1411_v50 }
 0x2ce   :  { %v1666_v4 = vadd.f32 %v1665_v12, %v1635_v30  ;;  %v1293_v25 = vpop.f32.mrf.mxu2 }
 0x2cf   :  { %v1362_v6 = vpop.f32.mrf.mxu3  ;;  %v1294_v18 = vadd.f32 %v1293_v25, %v2835_v40 }
 0x2d0   :  { %v1363_v47 = vadd.f32 %v1362_v6, %v1274_v11 }
 0x2d2   :  { %v1412_v32 = vmax.f32 %v1363_v47, 0.0 }
 0x2d4   :  { %v1636_v15 = vmul.f32 %v1559_v53, %v1412_v32 }
 0x2d6   :  { %v1667_v2 = vadd.f32 %v1666_v4, %v1636_v15  ;;  %v1295_v5 = vpop.f32.mrf.mxu2  ;;  %v1594_v4 = vpop.permute.xlu1 %1593 }
 0x2d7   :  { %v1364_v9 = vpop.f32.mrf.mxu3  ;;  %v1296_v28 = vadd.f32 %v1295_v5, %v2839_v48 }
 0x2d8   :  { %v1365_v26 = vadd.f32 %v1364_v9, %v1276_v17 }
 0x2da   :  { %v1413_v54 = vmax.f32 %v1365_v26, 0.0 }
 0x2dc   :  { %v1637_v63 = vmul.f32 %v1564_v51, %v1413_v54 }
 0x2de   :  { %v1298_v10 = vpop.f32.mrf.mxu2  ;;  %v1668_v12 = vadd.f32 %v1667_v2, %v1637_v63 }
 0x2df   :  { %v1367_v7 = vpop.f32.mrf.mxu3  ;;  %v1299_v27 = vadd.f32 %v1298_v10, %v2837_v45 }
 0x2e0   :  { %v1368_v0 = vadd.f32 %v1367_v7, %v1279_v3 }
 0x2e2   :  { %v1414_v49 = vmax.f32 %v1368_v0, 0.0 }
 0x2e4   :  { %v1638_v1 = vmul.f32 %v1569_v60, %v1414_v49 }
 0x2e6   :  { %v1669_v50 = vadd.f32 %v1668_v12, %v1638_v1 }
 0x2e7   :  { %v1369_v46 = vpop.f32.mrf.mxu3 }
 0x2e8   :  { %v1370_v22 = vadd.f32 %v1369_v46, %v1281_v55  ;;  %v1300_v46 = vpop.f32.mrf.mxu2 }
 0x2e9   :  { %v1301_v45 = vadd.f32 %v1300_v46, %v2849_v24 }
 0x2ea   :  { %v1415_v41 = vmax.f32 %v1370_v22, 0.0 }
 0x2ec   :  { %v1639_v38 = vmul.f32 %v1574_v31, %v1415_v41 }
 0x2ee   :  { %v1670_v6 = vadd.f32 %v1669_v50, %v1639_v38 }
 0x2ef   :  { %v1372_v29 = vpop.f32.mrf.mxu3 }
 0x2f0   :  { %v1373_v58 = vadd.f32 %v1372_v29, %v1284_v35 }
 0x2f2   :  { %v1416_v37 = vmax.f32 %v1373_v58, 0.0 }
 0x2f4   :  { %v1640_v52 = vmul.f32 %v1579_v8, %v1416_v37 }
 0x2f6   :  { %v1671_v36 = vadd.f32 %v1670_v6, %v1640_v52 }
 0x2f7   :  { %v1374_v13 = vpop.f32.mrf.mxu3 }
 0x2f8   :  { %v1375_v21 = vadd.f32 %v1374_v13, %v1286_v43  ;;  %v1689_v43 = vpop.permute.xlu0 %1688 }
 0x2f9   :  { %v1691_v24 = vperm.slane %v1689_v43, 0 }
 0x2fa   :  { %v1417_v20 = vmax.f32 %v1375_v21, 0.0 }
 0x2fc   :  { %v1641_v47 = vmul.f32 %v1584_v44, %v1417_v20 }
 0x2fe   :  { %v1672_v7 = vadd.f32 %v1671_v36, %v1641_v47 }
 0x2ff   :  { %v1377_v14 = vpop.f32.mrf.mxu3 }
 0x300   :  { %v1378_v62 = vadd.f32 %v1377_v14, %v1289_v61 }
 0x302   :  { %v1418_v30 = vmax.f32 %v1378_v62, 0.0 }
 0x304   :  { %v1642_v15 = vmul.f32 %v1589_v57, %v1418_v30 }
 0x306   :  { %v1673_v29 = vadd.f32 %v1672_v7, %v1642_v15 }
 0x307   :  { %v1379_v34 = vpop.f32.mrf.mxu3 }
 0x308   :  { %v1380_v59 = vadd.f32 %v1379_v34, %v1291_v19  ;;  %v1609_v34 = vpop.permute.xlu1 %1608 }
 0x30a   :  { %v1419_v32 = vmax.f32 %v1380_v59, 0.0 }
 0x30c   :  { %v1643_v23 = vmul.f32 %v1594_v4, %v1419_v32 }
 0x30e   :  { %v1674_v14 = vadd.f32 %v1673_v29, %v1643_v23 }
 0x30f   :  { %v1382_v39 = vpop.f32.mrf.mxu3 }
 0x310   :  { %v1383_v11 = vadd.f32 %v1382_v39, %v1294_v18  ;;  %v1614_v39 = vpop.permute.xlu2 %1613 }
 0x312   :  { %v1420_v2 = vmax.f32 %v1383_v11, 0.0 }
 0x314   :  { %v1644_v33 = vmul.f32 %v1599_v56, %v1420_v2 }
 0x316   :  { %v1675_v17 = vadd.f32 %v1674_v14, %v1644_v33 }
 0x317   :  { %v1384_v42 = vpop.f32.mrf.mxu3 }
 0x318   :  { %v1385_v53 = vadd.f32 %v1384_v42, %v1296_v28 }
 0x31a   :  { %v1421_v48 = vmax.f32 %v1385_v53, 0.0 }
 0x31c   :  { %v1645_v25 = vmul.f32 %v1604_v16, %v1421_v48 }
 0x31e   :  { %v1676_v26 = vadd.f32 %v1675_v17, %v1645_v25 }
 0x31f   :  { %v1387_v40 = vpop.f32.mrf.mxu3 }
 0x320   :  { %v1388_v9 = vadd.f32 %v1387_v40, %v1299_v27 }
 0x322   :  { %v1422_v13 = vmax.f32 %v1388_v9, 0.0 }
 0x324   :  { %v1646_v60 = vmul.f32 %v1609_v34, %v1422_v13 }
 0x326   :  { %v1677_v55 = vadd.f32 %v1676_v26, %v1646_v60 }
 0x327   :  { %v1389_v51 = vpop.f32.mrf.mxu3 }
 0x328   :  { %v1390_v3 = vadd.f32 %v1389_v51, %v1301_v45 }
 0x32a   :  { %v1423_v5 = vmax.f32 %v1390_v3, 0.0 }
 0x32c   :  { %v1647_v0 = vmul.f32 %v1614_v39, %v1423_v5 }
 0x32e   :  { %v1678_v31 = vadd.f32 %v1677_v55, %v1647_v0 }
 0x330   :  { %v1679_v35 = vrot.slane %v1678_v31, 4 }
 0x332   :  { %v1680_v54 = vadd.f32 %v1679_v35, %v1678_v31 }
 0x334   :  { %v1681_v22 = vrot.slane %v1680_v54, 2 }
 0x336   :  { %v1682_v8 = vadd.f32 %v1681_v22, %v1680_v54 }
 0x338   :  { %v1683_v49 = vrot.slane %v1682_v8, 1 }
 0x33a   :  { %v1684_v58 = vadd.f32 %v1683_v49, %v1682_v8 }
 0x33c   :  { %v1692_v61 = vadd.f32 %v1691_v24, %v1684_v58 }
 0x33e   :  { %1693 = vst [vmem:[%s2935_s9] sm:$0x1] %v1692_v61 }

</bundles_post_ra>
